<compile_context>
chip_gen: v6e
topology: v6e:2x2x1
jax: 0.10.0
libtpu: 0.0.40
codegen_flags: <defaults>
</compile_context>

<pallas_src>
import functools

import jax
import jax.numpy as jnp
from jax.experimental import pallas as pl
from jax.experimental.pallas import tpu as pltpu

BN_EPS = 1e-5
NEG = -1.0e30          # finite "-inf" pad: every pool window contains its (real)
                       # center, so this is exactly PyTorch's -inf padding, without
                       # creating inf/NaN in the (discarded) gutter matmul columns.


# --------------------------------------------------------------------------- #
# Fused SPP kernel: cv1 (1x1 conv + BN + SiLU) -> maxpools(5,9,13) -> concat ->
# cv2 (1x1 conv + BN + SiLU), one grid step per image.
# --------------------------------------------------------------------------- #
def _spp_kernel(H, W, Wp, S0, MSLAB, c_pad, radii,
                x_ref, w1_ref, b1_ref, w2_ref, b2_ref,
                o_ref, y_sc, rm_sc):
    pmax = radii[-1]

    # One-time fill of the guard rows / per-row gutters.  Scratch persists across
    # grid steps; everything inside the slab that matters is overwritten each step.
    @pl.when(pl.program_id(0) == 0)
    def _init():
        y_sc[...] = jnp.full(y_sc.shape, NEG, jnp.float32)
        rm_sc[...] = jnp.full(rm_sc.shape, NEG, jnp.float32)

    # cv1: 1x1 conv (BN scale folded into the bf16 weights) + bias + SiLU, dense.
    y = jnp.dot(w1_ref[...], x_ref[...], preferred_element_type=jnp.float32)
    y = y + b1_ref[...]
    y = y * jax.nn.sigmoid(y)                              # (c_pad, H*W) f32

    # Scatter y rows into the guttered slab layout (row stride Wp, data starts at
    # column pmax of each row); gutters/guard rows keep their NEG fill.
    for h in range(H):
        dst = S0 + h * Wp + pmax
        y_sc[:, dst:dst + W] = y[:, h * W:(h + 1) * W]

    def slab(ref, off=0):                                  # static slice, no masks
        return ref[:, S0 + off:S0 + off + MSLAB]

    y_slab = slab(y_sc)

    # cv2 identity branch (first channel group of cv2).
    acc = jnp.dot(w2_ref[:, 0:c_pad], y_slab.astype(jnp.bfloat16),
                  preferred_element_type=jnp.float32)

    # Separable max pooling, shared incrementally across the 5/9/13 windows.
    prev_r = 0
    rm = y_slab
    for g, r in enumerate(radii, start=1):
        if prev_r == 0:
            # first pool: direct row-max over [-r, r] from y (gutters give padding)
            for dw in range(1, r + 1):
                rm = jnp.maximum(rm, slab(y_sc, -dw))
                rm = jnp.maximum(rm, slab(y_sc, +dw))
        else:
            # log-widening: rowmax_r = max(rowmax_prev(-d), rowmax_prev(+d)), d<=prev_r
            d = r - prev_r
            rm = jnp.maximum(slab(rm_sc, -d), slab(rm_sc, +d))
        rm_sc[:, S0:S0 + MSLAB] = rm                       # needed for the H pass

        # H-direction max over [-r, r]: flat shifts by +-dh*Wp, guard rows = NEG.
        pooled = rm
        for dh in range(1, r + 1):
            pooled = jnp.maximum(pooled, slab(rm_sc, -dh * Wp))
            pooled = jnp.maximum(pooled, slab(rm_sc, +dh * Wp))

        # cv2 contribution of this pooled group (concat folded into the sum).
        acc = acc + jnp.dot(w2_ref[:, g * c_pad:(g + 1) * c_pad],
                            pooled.astype(jnp.bfloat16),
                            preferred_element_type=jnp.float32)
        prev_r = r

    z = acc + b2_ref[...]
    z = z * jax.nn.sigmoid(z)                              # SiLU of cv2
    o_ref[...] = z.astype(o_ref.dtype)


def _round_up(v, m):
    return -(-v // m) * m


def spp_forward(x_nchw, params, pools=(5, 9, 13)):
    """SPP forward. x: (N, C1, H, W) float32 NCHW (PyTorch layout)."""
    pools = tuple(pools)
    assert pools == tuple(sorted(pools)) and all(k % 2 == 1 for k in pools)
    radii = tuple(k // 2 for k in pools)
    for a, b in zip(radii[:-1], radii[1:]):
        assert 0 < b - a <= a, "log-widening needs r_{i+1} - r_i <= r_i"

    N, C1, H, W = x_nchw.shape
    c_ = params["cv1"]["w"].shape[0]
    c2 = params["cv2"]["w"].shape[0]
    HW = H * W
    assert HW % 128 == 0, "this kernel assumes H*W is a multiple of 128"

    pmax = radii[-1]
    Wp = W + 2 * pmax                          # row stride incl. left/right gutters
    MSLAB = _round_up(H * Wp, 128)             # lane-dense working slab per image
    S0 = _round_up(pmax * Wp, 128)             # slab start (>= pmax guard rows above)
    L = _round_up(S0 + MSLAB + pmax * Wp, 128)  # scratch length incl. bottom guard

    G = len(pools) + 1                         # cv2 input channel groups
    C1p = _round_up(C1, 8)
    c_p = _round_up(c_, 8)
    c2p = _round_up(c2, 8)

    # Fold the inference-BN scale into the 1x1 conv weights, pad channels to x8,
    # cast the MXU operands to bf16 (accumulation stays f32 in-kernel).
    w1 = params["cv1"]["w"] * params["cv1"]["scale"][:, None]           # (c_, C1)
    w1p = jnp.pad(w1, ((0, c_p - c_), (0, C1p - C1))).astype(jnp.bfloat16)
    b1p = jnp.pad(params["cv1"]["bias"], (0, c_p - c_))[:, None]        # (c_p, 1)

    w2 = params["cv2"]["w"] * params["cv2"]["scale"][:, None]           # (c2, G*c_)
    w2g = jnp.pad(w2.reshape(c2, G, c_),
                  ((0, c2p - c2), (0, 0), (0, c_p - c_)))
    w2p = w2g.reshape(c2p, G * c_p).astype(jnp.bfloat16)
    b2p = jnp.pad(params["cv2"]["bias"], (0, c2p - c2))[:, None]        # (c2p, 1)

    # Channel-major, image-major lane-dense input: (C1p, N*H*W) bf16.
    x_cm = jnp.transpose(x_nchw, (1, 0, 2, 3)).reshape(C1, N * HW)
    x_cm = jnp.pad(x_cm, ((0, C1p - C1), (0, 0))).astype(jnp.bfloat16)

    # VMEM budget: double-buffered in/out blocks + weights + the two guard scratches.
    vmem_need = (2 * (C1p * HW * 2 + c2p * MSLAB * 4)
                 + (c_p * C1p + c2p * G * c_p) * 2 + (c_p + c2p) * 4
                 + 2 * c_p * L * 4 + (1 << 20))
    vmem_limit = int(min(96 << 20, max(32 << 20, vmem_need)))

    kernel = functools.partial(_spp_kernel, H, W, Wp, S0, MSLAB, c_p, radii)
    out = pl.pallas_call(
        kernel,
        grid=(N,),
        in_specs=[
            pl.BlockSpec((C1p, HW), lambda n: (0, n)),        # x, one image / step
            pl.BlockSpec((c_p, C1p), lambda n: (0, 0)),       # fused cv1 weight bf16
            pl.BlockSpec((c_p, 1), lambda n: (0, 0)),         # fused cv1 bias  f32
            pl.BlockSpec((c2p, G * c_p), lambda n: (0, 0)),   # fused cv2 weight bf16
            pl.BlockSpec((c2p, 1), lambda n: (0, 0)),         # fused cv2 bias  f32
        ],
        out_specs=pl.BlockSpec((c2p, MSLAB), lambda n: (0, n)),
        out_shape=jax.ShapeDtypeStruct((c2p, N * MSLAB), jnp.float32),
        scratch_shapes=[pltpu.VMEM((c_p, L), jnp.float32),    # y   (gutter layout)
                        pltpu.VMEM((c_p, L), jnp.float32)],   # row-max (gutter layout)
        compiler_params=pltpu.CompilerParams(
            # "arbitrary": the persistent-scratch guard init at program_id == 0 is
            # only safe if a single core walks the whole grid in order.
            dimension_semantics=("arbitrary",),
            vmem_limit_bytes=vmem_limit),
    )(x_cm, w1p, b1p, w2p, b2p)

    out = out.reshape(c2p, N, MSLAB)[:, :, :H * Wp].reshape(c2p, N, H, Wp)
    out = out[:c2, :, :, pmax:pmax + W]                       # strip gutters/padding
    return jnp.transpose(out, (1, 0, 2, 3))


# --------------------------------------------------------------------------- #
# Parameter init (deterministic, synthetic) — ultralytics Conv = Conv2d(bias=False)
# + BatchNorm2d + SiLU, pre-fused to (w, scale, bias) for inference.
# --------------------------------------------------------------------------- #
def _fuse_bn(gamma, beta, mean, var, eps=BN_EPS):
    scale = gamma / jnp.sqrt(var + eps)
    return scale, beta - mean * scale


def _init_conv_bn(key, cin, cout):
    k1, k2, k3, k4, k5 = jax.random.split(key, 5)
    w = jax.random.normal(k1, (cout, cin), jnp.float32) * 0.3       # 1x1 conv weight
    gamma = jax.random.uniform(k2, (cout,), jnp.float32, 0.5, 1.5)
    beta = jax.random.normal(k3, (cout,), jnp.float32) * 0.1
    mean = jax.random.normal(k4, (cout,), jnp.float32) * 0.1
    var = jax.random.uniform(k5, (cout,), jnp.float32, 0.5, 1.5)
    scale, bias = _fuse_bn(gamma, beta, mean, var)
    return {"w": w, "scale": scale, "bias": bias}


def init_spp(key, c1, c2, pools=(5, 9, 13)):
    c_ = c1 // 2
    k1, k2 = jax.random.split(key)
    return {"cv1": _init_conv_bn(k1, c1, c_),
            "cv2": _init_conv_bn(k2, c_ * (len(pools) + 1), c2)}


# --------------------------------------------------------------------------- #
# Plain-JAX references (numerical sanity checks only).
# --------------------------------------------------------------------------- #
def _maxpool_same(y, k):
    p = k // 2
    return jax.lax.reduce_window(
        y, jnp.array(-jnp.inf, dtype=y.dtype), jax.lax.max,
        (1, 1, k, k), (1, 1, 1, 1),
        [(0, 0), (0, 0), (p, p), (p, p)])


def _spp_ref_f32(x, params, pools=(5, 9, 13)):
    """Exact f32 semantics of the PyTorch module."""
    def conv_bn_silu(xx, p):
        y = jnp.einsum("oc,nchw->nohw", p["w"] * p["scale"][:, None], xx,
                       precision=jax.lax.Precision.HIGHEST)
        y = y + p["bias"][None, :, None, None]
        return y * jax.nn.sigmoid(y)

    y = conv_bn_silu(x, params["cv1"])
    cat = jnp.concatenate([y] + [_maxpool_same(y, k) for k in pools], axis=1)
    return conv_bn_silu(cat, params["cv2"])


def _spp_ref_mixed(x, params, pools=(5, 9, 13)):
    """Reference mirroring the kernel's bf16 MXU operands (f32 accumulation)."""
    bf = lambda a: a.astype(jnp.bfloat16).astype(jnp.float32)

    w1 = params["cv1"]["w"] * params["cv1"]["scale"][:, None]
    y = jnp.einsum("oc,nchw->nohw", bf(w1), bf(x),
                   precision=jax.lax.Precision.HIGHEST)
    y = y + params["cv1"]["bias"][None, :, None, None]
    y = y * jax.nn.sigmoid(y)

    cat = jnp.concatenate([y] + [_maxpool_same(y, k) for k in pools], axis=1)
    w2 = params["cv2"]["w"] * params["cv2"]["scale"][:, None]
    z = jnp.einsum("oc,nchw->nohw", bf(w2), bf(cat),
                   precision=jax.lax.Precision.HIGHEST)
    z = z + params["cv2"]["bias"][None, :, None, None]
    return z * jax.nn.sigmoid(z)


# --------------------------------------------------------------------------- #
if __name__ == "__main__":
    key = jax.random.PRNGKey(0)
    kx, kp = jax.random.split(key)

    # SPP(c1=4, c2=8, k=(5, 9, 13)) on a (2, 4, 16, 16) NCHW input.
    c1, c2 = 4, 8
    pools = (5, 9, 13)
    x = jax.random.normal(kx, (2, c1, 16, 16), jnp.float32)
    params = init_spp(kp, c1, c2, pools)

    out = jax.block_until_ready(spp_forward(x, params, pools))
    assert out.shape == (2, c2, 16, 16), out.shape

    # Tight check against a reference using the same bf16 matmul operands.
    ref_mx = _spp_ref_mixed(x, params, pools)
    err_mx = float(jnp.max(jnp.abs(out - ref_mx)))
    assert jnp.allclose(out, ref_mx, rtol=1e-2, atol=1e-2), err_mx

    # Looser check against the exact f32 module semantics (bf16 operand rounding).
    ref32 = _spp_ref_f32(x, params, pools)
    err32 = float(jnp.max(jnp.abs(out - ref32)))
    assert jnp.allclose(out, ref32, rtol=5e-2, atol=5e-2), err32

    print("KERNEL_OK")
</pallas_src>

<mosaic_0001>
module attributes {stable_mosaic.version = 11 : i64} {
  func.func @_spp_kernel(%arg0: i32, %arg1: memref<8x256xbf16, #tpu.memory_space<vmem>>, %arg2: memref<8x8xbf16, #tpu.memory_space<vmem>>, %arg3: memref<8x1xf32, #tpu.memory_space<vmem>>, %arg4: memref<8x32xbf16, #tpu.memory_space<vmem>>, %arg5: memref<8x1xf32, #tpu.memory_space<vmem>>, %arg6: memref<8x512xf32, #tpu.memory_space<vmem>>, %arg7: memref<8x1024xf32, #tpu.memory_space<vmem>>, %arg8: memref<8x1024xf32, #tpu.memory_space<vmem>>) attributes {dimension_semantics = [#tpu.dimension_semantics<arbitrary>], iteration_bounds = array<i64: 2>, scalar_prefetch = 0 : i64, scratch_operands = 2 : i64, tpu.core_type = #tpu.core_type<tc>, window_params = [{transform_indices = @transform_0, window_bounds = array<i64: 8, 256>}, {pipeline_mode = #tpu.pipeline_mode<synchronous>, transform_indices = @transform_1, window_bounds = array<i64: 8, 8>}, {pipeline_mode = #tpu.pipeline_mode<synchronous>, transform_indices = @transform_2, window_bounds = array<i64: 8, 1>}, {pipeline_mode = #tpu.pipeline_mode<synchronous>, transform_indices = @transform_3, window_bounds = array<i64: 8, 32>}, {pipeline_mode = #tpu.pipeline_mode<synchronous>, transform_indices = @transform_4, window_bounds = array<i64: 8, 1>}, {transform_indices = @transform_5, window_bounds = array<i64: 8, 512>}]} {
    %c0_i32 = arith.constant 0 : i32
    %0 = arith.cmpi eq, %arg0, %c0_i32 : i32
    %1 = arith.extui %0 : i1 to i32
    %c0_i32_0 = arith.constant 0 : i32
    %2 = arith.cmpi ne, %1, %c0_i32_0 : i32
    scf.if %2 {
      %cst_92 = arith.constant -1.000000e+30 : f32
      %138 = vector.broadcast %cst_92 : f32 to vector<8x1024xf32>
      %c0_93 = arith.constant 0 : index
      %c0_94 = arith.constant 0 : index
      %139 = vector.load %arg7[%c0_93, %c0_94] : memref<8x1024xf32, #tpu.memory_space<vmem>>, vector<8x1024xf32>
      tpu.vector_store %arg7[%c0_93, %c0_94], %138 {strides = array<i32>} : memref<8x1024xf32, #tpu.memory_space<vmem>>, vector<8x1024xf32>,
      %cst_95 = arith.constant -1.000000e+30 : f32
      %140 = vector.broadcast %cst_95 : f32 to vector<8x1024xf32>
      %c0_96 = arith.constant 0 : index
      %c0_97 = arith.constant 0 : index
      %141 = vector.load %arg8[%c0_96, %c0_97] : memref<8x1024xf32, #tpu.memory_space<vmem>>, vector<8x1024xf32>
      tpu.vector_store %arg8[%c0_96, %c0_97], %140 {strides = array<i32>} : memref<8x1024xf32, #tpu.memory_space<vmem>>, vector<8x1024xf32>,
    } else {
    }
    %c0 = arith.constant 0 : index
    %c0_1 = arith.constant 0 : index
    %3 = vector.load %arg2[%c0, %c0_1] : memref<8x8xbf16, #tpu.memory_space<vmem>>, vector<8x8xbf16>
    %c0_2 = arith.constant 0 : index
    %c0_3 = arith.constant 0 : index
    %4 = vector.load %arg1[%c0_2, %c0_3] : memref<8x256xbf16, #tpu.memory_space<vmem>>, vector<8x256xbf16>
    %cst = arith.constant dense<0.000000e+00> : vector<8x256xf32>
    %5 = tpu.matmul %3, %4, %cst {dimension_numbers = #tpu.dot_dimension_numbers<[1], [0], [0], [1], [0, 0, 1, 1], [], []>} : vector<8x8xbf16>, vector<8x256xbf16>, vector<8x256xf32> -> vector<8x256xf32>
    %c0_4 = arith.constant 0 : index
    %c0_5 = arith.constant 0 : index
    %6 = vector.load %arg3[%c0_4, %c0_5] : memref<8x1xf32, #tpu.memory_space<vmem>>, vector<8x1xf32>
    %7 = vector.broadcast %6 : vector<8x1xf32> to vector<8x256xf32>
    %8 = arith.addf %5, %7 : vector<8x256xf32>
    %9 = arith.negf %8 : vector<8x256xf32>
    %10 = math.exp %9 : vector<8x256xf32>
    %cst_6 = arith.constant 1.000000e+00 : f32
    %11 = vector.broadcast %cst_6 : f32 to vector<8x256xf32>
    %12 = arith.addf %11, %10 : vector<8x256xf32>
    %13 = arith.divf %11, %12 : vector<8x256xf32>
    %14 = arith.mulf %8, %13 : vector<8x256xf32>
    %15 = vector.extract_strided_slice %14 {offsets = [0, 0], sizes = [8, 16], strides = [1, 1]} : vector<8x256xf32> to vector<8x16xf32>
    %c0_7 = arith.constant 0 : index
    %c262 = arith.constant 262 : index
    %16 = vector.load %arg7[%c0_7, %c262] : memref<8x1024xf32, #tpu.memory_space<vmem>>, vector<8x16xf32>
    tpu.vector_store %arg7[%c0_7, %c262], %15 {strides = array<i32>} : memref<8x1024xf32, #tpu.memory_space<vmem>>, vector<8x16xf32>,
    %17 = vector.extract_strided_slice %14 {offsets = [0, 16], sizes = [8, 16], strides = [1, 1]} : vector<8x256xf32> to vector<8x16xf32>
    %c0_8 = arith.constant 0 : index
    %c290 = arith.constant 290 : index
    %18 = vector.load %arg7[%c0_8, %c290] : memref<8x1024xf32, #tpu.memory_space<vmem>>, vector<8x16xf32>
    tpu.vector_store %arg7[%c0_8, %c290], %17 {strides = array<i32>} : memref<8x1024xf32, #tpu.memory_space<vmem>>, vector<8x16xf32>,
    %19 = vector.extract_strided_slice %14 {offsets = [0, 32], sizes = [8, 16], strides = [1, 1]} : vector<8x256xf32> to vector<8x16xf32>
    %c0_9 = arith.constant 0 : index
    %c318 = arith.constant 318 : index
    %20 = vector.load %arg7[%c0_9, %c318] : memref<8x1024xf32, #tpu.memory_space<vmem>>, vector<8x16xf32>
    tpu.vector_store %arg7[%c0_9, %c318], %19 {strides = array<i32>} : memref<8x1024xf32, #tpu.memory_space<vmem>>, vector<8x16xf32>,
    %21 = vector.extract_strided_slice %14 {offsets = [0, 48], sizes = [8, 16], strides = [1, 1]} : vector<8x256xf32> to vector<8x16xf32>
    %c0_10 = arith.constant 0 : index
    %c346 = arith.constant 346 : index
    %22 = vector.load %arg7[%c0_10, %c346] : memref<8x1024xf32, #tpu.memory_space<vmem>>, vector<8x16xf32>
    tpu.vector_store %arg7[%c0_10, %c346], %21 {strides = array<i32>} : memref<8x1024xf32, #tpu.memory_space<vmem>>, vector<8x16xf32>,
    %23 = vector.extract_strided_slice %14 {offsets = [0, 64], sizes = [8, 16], strides = [1, 1]} : vector<8x256xf32> to vector<8x16xf32>
    %c0_11 = arith.constant 0 : index
    %c374 = arith.constant 374 : index
    %24 = vector.load %arg7[%c0_11, %c374] : memref<8x1024xf32, #tpu.memory_space<vmem>>, vector<8x16xf32>
    tpu.vector_store %arg7[%c0_11, %c374], %23 {strides = array<i32>} : memref<8x1024xf32, #tpu.memory_space<vmem>>, vector<8x16xf32>,
    %25 = vector.extract_strided_slice %14 {offsets = [0, 80], sizes = [8, 16], strides = [1, 1]} : vector<8x256xf32> to vector<8x16xf32>
    %c0_12 = arith.constant 0 : index
    %c402 = arith.constant 402 : index
    %26 = vector.load %arg7[%c0_12, %c402] : memref<8x1024xf32, #tpu.memory_space<vmem>>, vector<8x16xf32>
    tpu.vector_store %arg7[%c0_12, %c402], %25 {strides = array<i32>} : memref<8x1024xf32, #tpu.memory_space<vmem>>, vector<8x16xf32>,
    %27 = vector.extract_strided_slice %14 {offsets = [0, 96], sizes = [8, 16], strides = [1, 1]} : vector<8x256xf32> to vector<8x16xf32>
    %c0_13 = arith.constant 0 : index
    %c430 = arith.constant 430 : index
    %28 = vector.load %arg7[%c0_13, %c430] : memref<8x1024xf32, #tpu.memory_space<vmem>>, vector<8x16xf32>
    tpu.vector_store %arg7[%c0_13, %c430], %27 {strides = array<i32>} : memref<8x1024xf32, #tpu.memory_space<vmem>>, vector<8x16xf32>,
    %29 = vector.extract_strided_slice %14 {offsets = [0, 112], sizes = [8, 16], strides = [1, 1]} : vector<8x256xf32> to vector<8x16xf32>
    %c0_14 = arith.constant 0 : index
    %c458 = arith.constant 458 : index
    %30 = vector.load %arg7[%c0_14, %c458] : memref<8x1024xf32, #tpu.memory_space<vmem>>, vector<8x16xf32>
    tpu.vector_store %arg7[%c0_14, %c458], %29 {strides = array<i32>} : memref<8x1024xf32, #tpu.memory_space<vmem>>, vector<8x16xf32>,
    %31 = vector.extract_strided_slice %14 {offsets = [0, 128], sizes = [8, 16], strides = [1, 1]} : vector<8x256xf32> to vector<8x16xf32>
    %c0_15 = arith.constant 0 : index
    %c486 = arith.constant 486 : index
    %32 = vector.load %arg7[%c0_15, %c486] : memref<8x1024xf32, #tpu.memory_space<vmem>>, vector<8x16xf32>
    tpu.vector_store %arg7[%c0_15, %c486], %31 {strides = array<i32>} : memref<8x1024xf32, #tpu.memory_space<vmem>>, vector<8x16xf32>,
    %33 = vector.extract_strided_slice %14 {offsets = [0, 144], sizes = [8, 16], strides = [1, 1]} : vector<8x256xf32> to vector<8x16xf32>
    %c0_16 = arith.constant 0 : index
    %c514 = arith.constant 514 : index
    %34 = vector.load %arg7[%c0_16, %c514] : memref<8x1024xf32, #tpu.memory_space<vmem>>, vector<8x16xf32>
    tpu.vector_store %arg7[%c0_16, %c514], %33 {strides = array<i32>} : memref<8x1024xf32, #tpu.memory_space<vmem>>, vector<8x16xf32>,
    %35 = vector.extract_strided_slice %14 {offsets = [0, 160], sizes = [8, 16], strides = [1, 1]} : vector<8x256xf32> to vector<8x16xf32>
    %c0_17 = arith.constant 0 : index
    %c542 = arith.constant 542 : index
    %36 = vector.load %arg7[%c0_17, %c542] : memref<8x1024xf32, #tpu.memory_space<vmem>>, vector<8x16xf32>
    tpu.vector_store %arg7[%c0_17, %c542], %35 {strides = array<i32>} : memref<8x1024xf32, #tpu.memory_space<vmem>>, vector<8x16xf32>,
    %37 = vector.extract_strided_slice %14 {offsets = [0, 176], sizes = [8, 16], strides = [1, 1]} : vector<8x256xf32> to vector<8x16xf32>
    %c0_18 = arith.constant 0 : index
    %c570 = arith.constant 570 : index
    %38 = vector.load %arg7[%c0_18, %c570] : memref<8x1024xf32, #tpu.memory_space<vmem>>, vector<8x16xf32>
    tpu.vector_store %arg7[%c0_18, %c570], %37 {strides = array<i32>} : memref<8x1024xf32, #tpu.memory_space<vmem>>, vector<8x16xf32>,
    %39 = vector.extract_strided_slice %14 {offsets = [0, 192], sizes = [8, 16], strides = [1, 1]} : vector<8x256xf32> to vector<8x16xf32>
    %c0_19 = arith.constant 0 : index
    %c598 = arith.constant 598 : index
    %40 = vector.load %arg7[%c0_19, %c598] : memref<8x1024xf32, #tpu.memory_space<vmem>>, vector<8x16xf32>
    tpu.vector_store %arg7[%c0_19, %c598], %39 {strides = array<i32>} : memref<8x1024xf32, #tpu.memory_space<vmem>>, vector<8x16xf32>,
    %41 = vector.extract_strided_slice %14 {offsets = [0, 208], sizes = [8, 16], strides = [1, 1]} : vector<8x256xf32> to vector<8x16xf32>
    %c0_20 = arith.constant 0 : index
    %c626 = arith.constant 626 : index
    %42 = vector.load %arg7[%c0_20, %c626] : memref<8x1024xf32, #tpu.memory_space<vmem>>, vector<8x16xf32>
    tpu.vector_store %arg7[%c0_20, %c626], %41 {strides = array<i32>} : memref<8x1024xf32, #tpu.memory_space<vmem>>, vector<8x16xf32>,
    %43 = vector.extract_strided_slice %14 {offsets = [0, 224], sizes = [8, 16], strides = [1, 1]} : vector<8x256xf32> to vector<8x16xf32>
    %c0_21 = arith.constant 0 : index
    %c654 = arith.constant 654 : index
    %44 = vector.load %arg7[%c0_21, %c654] : memref<8x1024xf32, #tpu.memory_space<vmem>>, vector<8x16xf32>
    tpu.vector_store %arg7[%c0_21, %c654], %43 {strides = array<i32>} : memref<8x1024xf32, #tpu.memory_space<vmem>>, vector<8x16xf32>,
    %45 = vector.extract_strided_slice %14 {offsets = [0, 240], sizes = [8, 16], strides = [1, 1]} : vector<8x256xf32> to vector<8x16xf32>
    %c0_22 = arith.constant 0 : index
    %c682 = arith.constant 682 : index
    %46 = vector.load %arg7[%c0_22, %c682] : memref<8x1024xf32, #tpu.memory_space<vmem>>, vector<8x16xf32>
    tpu.vector_store %arg7[%c0_22, %c682], %45 {strides = array<i32>} : memref<8x1024xf32, #tpu.memory_space<vmem>>, vector<8x16xf32>,
    %c0_23 = arith.constant 0 : index
    %c256 = arith.constant 256 : index
    %47 = vector.load %arg7[%c0_23, %c256] : memref<8x1024xf32, #tpu.memory_space<vmem>>, vector<8x512xf32>
    %c0_24 = arith.constant 0 : index
    %c0_25 = arith.constant 0 : index
    %48 = vector.load %arg4[%c0_24, %c0_25] : memref<8x32xbf16, #tpu.memory_space<vmem>>, vector<8x8xbf16>
    %49 = arith.truncf %47 : vector<8x512xf32> to vector<8x512xbf16>
    %cst_26 = arith.constant dense<0.000000e+00> : vector<8x512xf32>
    %50 = tpu.matmul %48, %49, %cst_26 {dimension_numbers = #tpu.dot_dimension_numbers<[1], [0], [0], [1], [0, 0, 1, 1], [], []>} : vector<8x8xbf16>, vector<8x512xbf16>, vector<8x512xf32> -> vector<8x512xf32>
    %c0_27 = arith.constant 0 : index
    %c255 = arith.constant 255 : index
    %51 = vector.load %arg7[%c0_27, %c255] : memref<8x1024xf32, #tpu.memory_space<vmem>>, vector<8x512xf32>
    %52 = arith.maximumf %47, %51 : vector<8x512xf32>
    %c0_28 = arith.constant 0 : index
    %c257 = arith.constant 257 : index
    %53 = vector.load %arg7[%c0_28, %c257] : memref<8x1024xf32, #tpu.memory_space<vmem>>, vector<8x512xf32>
    %54 = arith.maximumf %52, %53 : vector<8x512xf32>
    %c0_29 = arith.constant 0 : index
    %c254 = arith.constant 254 : index
    %55 = vector.load %arg7[%c0_29, %c254] : memref<8x1024xf32, #tpu.memory_space<vmem>>, vector<8x512xf32>
    %56 = arith.maximumf %54, %55 : vector<8x512xf32>
    %c0_30 = arith.constant 0 : index
    %c258 = arith.constant 258 : index
    %57 = vector.load %arg7[%c0_30, %c258] : memref<8x1024xf32, #tpu.memory_space<vmem>>, vector<8x512xf32>
    %58 = arith.maximumf %56, %57 : vector<8x512xf32>
    %c0_31 = arith.constant 0 : index
    %c256_32 = arith.constant 256 : index
    %59 = vector.load %arg8[%c0_31, %c256_32] : memref<8x1024xf32, #tpu.memory_space<vmem>>, vector<8x512xf32>
    tpu.vector_store %arg8[%c0_31, %c256_32], %58 {strides = array<i32>} : memref<8x1024xf32, #tpu.memory_space<vmem>>, vector<8x512xf32>,
    %c0_33 = arith.constant 0 : index
    %c228 = arith.constant 228 : index
    %60 = vector.load %arg8[%c0_33, %c228] : memref<8x1024xf32, #tpu.memory_space<vmem>>, vector<8x512xf32>
    %61 = arith.maximumf %58, %60 : vector<8x512xf32>
    %c0_34 = arith.constant 0 : index
    %c284 = arith.constant 284 : index
    %62 = vector.load %arg8[%c0_34, %c284] : memref<8x1024xf32, #tpu.memory_space<vmem>>, vector<8x512xf32>
    %63 = arith.maximumf %61, %62 : vector<8x512xf32>
    %c0_35 = arith.constant 0 : index
    %c200 = arith.constant 200 : index
    %64 = vector.load %arg8[%c0_35, %c200] : memref<8x1024xf32, #tpu.memory_space<vmem>>, vector<8x512xf32>
    %65 = arith.maximumf %63, %64 : vector<8x512xf32>
    %c0_36 = arith.constant 0 : index
    %c312 = arith.constant 312 : index
    %66 = vector.load %arg8[%c0_36, %c312] : memref<8x1024xf32, #tpu.memory_space<vmem>>, vector<8x512xf32>
    %67 = arith.maximumf %65, %66 : vector<8x512xf32>
    %c0_37 = arith.constant 0 : index
    %c8 = arith.constant 8 : index
    %68 = vector.load %arg4[%c0_37, %c8] : memref<8x32xbf16, #tpu.memory_space<vmem>>, vector<8x8xbf16>
    %69 = arith.truncf %67 : vector<8x512xf32> to vector<8x512xbf16>
    %cst_38 = arith.constant dense<0.000000e+00> : vector<8x512xf32>
    %70 = tpu.matmul %68, %69, %cst_38 {dimension_numbers = #tpu.dot_dimension_numbers<[1], [0], [0], [1], [0, 0, 1, 1], [], []>} : vector<8x8xbf16>, vector<8x512xbf16>, vector<8x512xf32> -> vector<8x512xf32>
    %71 = arith.addf %50, %70 : vector<8x512xf32>
    %c0_39 = arith.constant 0 : index
    %c254_40 = arith.constant 254 : index
    %72 = vector.load %arg8[%c0_39, %c254_40] : memref<8x1024xf32, #tpu.memory_space<vmem>>, vector<8x512xf32>
    %c0_41 = arith.constant 0 : index
    %c258_42 = arith.constant 258 : index
    %73 = vector.load %arg8[%c0_41, %c258_42] : memref<8x1024xf32, #tpu.memory_space<vmem>>, vector<8x512xf32>
    %74 = arith.maximumf %72, %73 : vector<8x512xf32>
    %c0_43 = arith.constant 0 : index
    %c256_44 = arith.constant 256 : index
    %75 = vector.load %arg8[%c0_43, %c256_44] : memref<8x1024xf32, #tpu.memory_space<vmem>>, vector<8x512xf32>
    tpu.vector_store %arg8[%c0_43, %c256_44], %74 {strides = array<i32>} : memref<8x1024xf32, #tpu.memory_space<vmem>>, vector<8x512xf32>,
    %c0_45 = arith.constant 0 : index
    %c228_46 = arith.constant 228 : index
    %76 = vector.load %arg8[%c0_45, %c228_46] : memref<8x1024xf32, #tpu.memory_space<vmem>>, vector<8x512xf32>
    %77 = arith.maximumf %74, %76 : vector<8x512xf32>
    %c0_47 = arith.constant 0 : index
    %c284_48 = arith.constant 284 : index
    %78 = vector.load %arg8[%c0_47, %c284_48] : memref<8x1024xf32, #tpu.memory_space<vmem>>, vector<8x512xf32>
    %79 = arith.maximumf %77, %78 : vector<8x512xf32>
    %c0_49 = arith.constant 0 : index
    %c200_50 = arith.constant 200 : index
    %80 = vector.load %arg8[%c0_49, %c200_50] : memref<8x1024xf32, #tpu.memory_space<vmem>>, vector<8x512xf32>
    %81 = arith.maximumf %79, %80 : vector<8x512xf32>
    %c0_51 = arith.constant 0 : index
    %c312_52 = arith.constant 312 : index
    %82 = vector.load %arg8[%c0_51, %c312_52] : memref<8x1024xf32, #tpu.memory_space<vmem>>, vector<8x512xf32>
    %83 = arith.maximumf %81, %82 : vector<8x512xf32>
    %c0_53 = arith.constant 0 : index
    %c172 = arith.constant 172 : index
    %84 = vector.load %arg8[%c0_53, %c172] : memref<8x1024xf32, #tpu.memory_space<vmem>>, vector<8x512xf32>
    %85 = arith.maximumf %83, %84 : vector<8x512xf32>
    %c0_54 = arith.constant 0 : index
    %c340 = arith.constant 340 : index
    %86 = vector.load %arg8[%c0_54, %c340] : memref<8x1024xf32, #tpu.memory_space<vmem>>, vector<8x512xf32>
    %87 = arith.maximumf %85, %86 : vector<8x512xf32>
    %c0_55 = arith.constant 0 : index
    %c144 = arith.constant 144 : index
    %88 = vector.load %arg8[%c0_55, %c144] : memref<8x1024xf32, #tpu.memory_space<vmem>>, vector<8x512xf32>
    %89 = arith.maximumf %87, %88 : vector<8x512xf32>
    %c0_56 = arith.constant 0 : index
    %c368 = arith.constant 368 : index
    %90 = vector.load %arg8[%c0_56, %c368] : memref<8x1024xf32, #tpu.memory_space<vmem>>, vector<8x512xf32>
    %91 = arith.maximumf %89, %90 : vector<8x512xf32>
    %c0_57 = arith.constant 0 : index
    %c16 = arith.constant 16 : index
    %92 = vector.load %arg4[%c0_57, %c16] : memref<8x32xbf16, #tpu.memory_space<vmem>>, vector<8x8xbf16>
    %93 = arith.truncf %91 : vector<8x512xf32> to vector<8x512xbf16>
    %cst_58 = arith.constant dense<0.000000e+00> : vector<8x512xf32>
    %94 = tpu.matmul %92, %93, %cst_58 {dimension_numbers = #tpu.dot_dimension_numbers<[1], [0], [0], [1], [0, 0, 1, 1], [], []>} : vector<8x8xbf16>, vector<8x512xbf16>, vector<8x512xf32> -> vector<8x512xf32>
    %95 = arith.addf %71, %94 : vector<8x512xf32>
    %c0_59 = arith.constant 0 : index
    %c254_60 = arith.constant 254 : index
    %96 = vector.load %arg8[%c0_59, %c254_60] : memref<8x1024xf32, #tpu.memory_space<vmem>>, vector<8x512xf32>
    %c0_61 = arith.constant 0 : index
    %c258_62 = arith.constant 258 : index
    %97 = vector.load %arg8[%c0_61, %c258_62] : memref<8x1024xf32, #tpu.memory_space<vmem>>, vector<8x512xf32>
    %98 = arith.maximumf %96, %97 : vector<8x512xf32>
    %c0_63 = arith.constant 0 : index
    %c256_64 = arith.constant 256 : index
    %99 = vector.load %arg8[%c0_63, %c256_64] : memref<8x1024xf32, #tpu.memory_space<vmem>>, vector<8x512xf32>
    tpu.vector_store %arg8[%c0_63, %c256_64], %98 {strides = array<i32>} : memref<8x1024xf32, #tpu.memory_space<vmem>>, vector<8x512xf32>,
    %c0_65 = arith.constant 0 : index
    %c228_66 = arith.constant 228 : index
    %100 = vector.load %arg8[%c0_65, %c228_66] : memref<8x1024xf32, #tpu.memory_space<vmem>>, vector<8x512xf32>
    %101 = arith.maximumf %98, %100 : vector<8x512xf32>
    %c0_67 = arith.constant 0 : index
    %c284_68 = arith.constant 284 : index
    %102 = vector.load %arg8[%c0_67, %c284_68] : memref<8x1024xf32, #tpu.memory_space<vmem>>, vector<8x512xf32>
    %103 = arith.maximumf %101, %102 : vector<8x512xf32>
    %c0_69 = arith.constant 0 : index
    %c200_70 = arith.constant 200 : index
    %104 = vector.load %arg8[%c0_69, %c200_70] : memref<8x1024xf32, #tpu.memory_space<vmem>>, vector<8x512xf32>
    %105 = arith.maximumf %103, %104 : vector<8x512xf32>
    %c0_71 = arith.constant 0 : index
    %c312_72 = arith.constant 312 : index
    %106 = vector.load %arg8[%c0_71, %c312_72] : memref<8x1024xf32, #tpu.memory_space<vmem>>, vector<8x512xf32>
    %107 = arith.maximumf %105, %106 : vector<8x512xf32>
    %c0_73 = arith.constant 0 : index
    %c172_74 = arith.constant 172 : index
    %108 = vector.load %arg8[%c0_73, %c172_74] : memref<8x1024xf32, #tpu.memory_space<vmem>>, vector<8x512xf32>
    %109 = arith.maximumf %107, %108 : vector<8x512xf32>
    %c0_75 = arith.constant 0 : index
    %c340_76 = arith.constant 340 : index
    %110 = vector.load %arg8[%c0_75, %c340_76] : memref<8x1024xf32, #tpu.memory_space<vmem>>, vector<8x512xf32>
    %111 = arith.maximumf %109, %110 : vector<8x512xf32>
    %c0_77 = arith.constant 0 : index
    %c144_78 = arith.constant 144 : index
    %112 = vector.load %arg8[%c0_77, %c144_78] : memref<8x1024xf32, #tpu.memory_space<vmem>>, vector<8x512xf32>
    %113 = arith.maximumf %111, %112 : vector<8x512xf32>
    %c0_79 = arith.constant 0 : index
    %c368_80 = arith.constant 368 : index
    %114 = vector.load %arg8[%c0_79, %c368_80] : memref<8x1024xf32, #tpu.memory_space<vmem>>, vector<8x512xf32>
    %115 = arith.maximumf %113, %114 : vector<8x512xf32>
    %c0_81 = arith.constant 0 : index
    %c116 = arith.constant 116 : index
    %116 = vector.load %arg8[%c0_81, %c116] : memref<8x1024xf32, #tpu.memory_space<vmem>>, vector<8x512xf32>
    %117 = arith.maximumf %115, %116 : vector<8x512xf32>
    %c0_82 = arith.constant 0 : index
    %c396 = arith.constant 396 : index
    %118 = vector.load %arg8[%c0_82, %c396] : memref<8x1024xf32, #tpu.memory_space<vmem>>, vector<8x512xf32>
    %119 = arith.maximumf %117, %118 : vector<8x512xf32>
    %c0_83 = arith.constant 0 : index
    %c88 = arith.constant 88 : index
    %120 = vector.load %arg8[%c0_83, %c88] : memref<8x1024xf32, #tpu.memory_space<vmem>>, vector<8x512xf32>
    %121 = arith.maximumf %119, %120 : vector<8x512xf32>
    %c0_84 = arith.constant 0 : index
    %c424 = arith.constant 424 : index
    %122 = vector.load %arg8[%c0_84, %c424] : memref<8x1024xf32, #tpu.memory_space<vmem>>, vector<8x512xf32>
    %123 = arith.maximumf %121, %122 : vector<8x512xf32>
    %c0_85 = arith.constant 0 : index
    %c24 = arith.constant 24 : index
    %124 = vector.load %arg4[%c0_85, %c24] : memref<8x32xbf16, #tpu.memory_space<vmem>>, vector<8x8xbf16>
    %125 = arith.truncf %123 : vector<8x512xf32> to vector<8x512xbf16>
    %cst_86 = arith.constant dense<0.000000e+00> : vector<8x512xf32>
    %126 = tpu.matmul %124, %125, %cst_86 {dimension_numbers = #tpu.dot_dimension_numbers<[1], [0], [0], [1], [0, 0, 1, 1], [], []>} : vector<8x8xbf16>, vector<8x512xbf16>, vector<8x512xf32> -> vector<8x512xf32>
    %127 = arith.addf %95, %126 : vector<8x512xf32>
    %c0_87 = arith.constant 0 : index
    %c0_88 = arith.constant 0 : index
    %128 = vector.load %arg5[%c0_87, %c0_88] : memref<8x1xf32, #tpu.memory_space<vmem>>, vector<8x1xf32>
    %129 = vector.broadcast %128 : vector<8x1xf32> to vector<8x512xf32>
    %130 = arith.addf %127, %129 : vector<8x512xf32>
    %131 = arith.negf %130 : vector<8x512xf32>
    %132 = math.exp %131 : vector<8x512xf32>
    %cst_89 = arith.constant 1.000000e+00 : f32
    %133 = vector.broadcast %cst_89 : f32 to vector<8x512xf32>
    %134 = arith.addf %133, %132 : vector<8x512xf32>
    %135 = arith.divf %133, %134 : vector<8x512xf32>
    %136 = arith.mulf %130, %135 : vector<8x512xf32>
    %c0_90 = arith.constant 0 : index
    %c0_91 = arith.constant 0 : index
    %137 = vector.load %arg6[%c0_90, %c0_91] : memref<8x512xf32, #tpu.memory_space<vmem>>, vector<8x512xf32>
    tpu.vector_store %arg6[%c0_90, %c0_91], %136 {strides = array<i32>} : memref<8x512xf32, #tpu.memory_space<vmem>>, vector<8x512xf32>,
    return
  }
  func.func @transform_0(%arg0: i32) -> (i32, i32) {
    %c0_i32 = arith.constant 0 : i32
    %c0_i32_0 = arith.constant 0 : i32
    return %c0_i32, %arg0 : i32, i32
  }
  func.func @transform_1(%arg0: i32) -> (i32, i32) {
    %c0_i32 = arith.constant 0 : i32
    %c0_i32_0 = arith.constant 0 : i32
    %c0_i32_1 = arith.constant 0 : i32
    return %c0_i32, %c0_i32_0 : i32, i32
  }
  func.func @transform_2(%arg0: i32) -> (i32, i32) {
    %c0_i32 = arith.constant 0 : i32
    %c0_i32_0 = arith.constant 0 : i32
    %c0_i32_1 = arith.constant 0 : i32
    return %c0_i32, %c0_i32_0 : i32, i32
  }
  func.func @transform_3(%arg0: i32) -> (i32, i32) {
    %c0_i32 = arith.constant 0 : i32
    %c0_i32_0 = arith.constant 0 : i32
    %c0_i32_1 = arith.constant 0 : i32
    return %c0_i32, %c0_i32_0 : i32, i32
  }
  func.func @transform_4(%arg0: i32) -> (i32, i32) {
    %c0_i32 = arith.constant 0 : i32
    %c0_i32_0 = arith.constant 0 : i32
    %c0_i32_1 = arith.constant 0 : i32
    return %c0_i32, %c0_i32_0 : i32, i32
  }
  func.func @transform_5(%arg0: i32) -> (i32, i32) {
    %c0_i32 = arith.constant 0 : i32
    %c0_i32_0 = arith.constant 0 : i32
    return %c0_i32, %arg0 : i32, i32
  }
}

</mosaic_0001>

<bundles_post_ra>
// kernel: tpu_custom_call.1
= control target key start
LH: loop header
LB: loop body
LE: loop exit
PB: predicated region body
PF: predicated region fallthrough
CT: control target
= control target key end

     0   :  { %10 = vsyncpa [#allocation5], 0  ;;  %s3251_s0 = inlined_call_operand.vmem [shape: bf16[8,512], index: 0, kind: input, shape index: {}]   ;;  %s3252_s1 = inlined_call_operand.hbm [shape: bf16[8,8], index: 1, kind: input, shape index: {}]   ;;  %s3253_s2 = inlined_call_operand.vmem [shape: f32[8,1], index: 2, kind: input, shape index: {}]   ;;  %s3254_s3 = inlined_call_operand.vmem [shape: bf16[8,32], index: 3, kind: input, shape index: {}]   ;;  %s3255_s4 = inlined_call_operand.vmem [shape: f32[8,1], index: 4, kind: input, shape index: {}]   ;;  %s3256_s5 = inlined_call_operand.hbm [shape: f32[8,1024], index: 5, kind: output, shape index: {}]  }
   0x1   :  { %11 = vsyncpa [#allocation6], 0 }
   0x2   :  { %13 = vsyncpa [#allocation6 + $0x1], 0  ;;  %s2474_s18 = smov 0   ;;  %s2476_s19 = smov 0  }
   0x3   :  { %s2478_s20 = smov 0   ;;  %s2480_s21 = smov 0  }
   0x4 LB: > { %s2495_s22 = sadd.s32 4294967295, %s2403_s21   ;;  %s1867_s23 = sadd.s32 4294967294, %s2403_s21   ;;  %s2403_s21 = sphi %s2480_s21, %s3272_s21   ;;  %s2399_s20 = sphi %s2478_s20, %s3271_s20   ;;  %s2395_s19 = sphi %s2476_s19, %s3270_s19   ;;  %s2391_s18 = sphi %s2474_s18, %s3269_s18  }
   0x5   : > { %s2499_s24 = sadd.s32 1, %s2403_s21   ;;  %s136_s25 = sadd.s32 1, %s2399_s20 }
   0x6   : > { %s133_s26 = ssub.s32 %s2403_s21, %s2499_s24  ;;  %p146_p0 = scmp.ne.s32.totalorder %s2399_s20, %s2395_s19 }
   0x7   : > { %p134_p1 = scmp.eq.s32.totalorder %s133_s26, 0  ;;  %p147_p2 = scmp.eq.s32.totalorder %s2495_s22, 1 }
   0x8   : > { %p152_p3 = scmp.ne.s32.totalorder %s2395_s19, %s2391_s18  ;;  %p153_p4 = scmp.eq.s32.totalorder %s1867_s23, 1 }
   0x9   : > { %s2510_s27 = scalar_select %p134_p1, %s2399_s20, %s136_s25  }
   0xa   : > { %p2512_p5 = por %p147_p2, %p146_p0  ;;  %p2516_p6 = por %p153_p4, %p152_p3 }
   0xb   : > { %p1868_p7 = scmp.ge.s32.totalorder %s2403_s21, 1  ;;  %p160_p8 = scmp.lt.s32.totalorder %s2403_s21, 3 }
   0xc   : > { %s3262_s29 = scalar_select %p2516_p6, 1, 0 }
   0xd   : > { %p1926_p10 = scmp.eq.s32.totalorder %s2495_s22, 0  ;;  %p2524_p11 = pnand %p1868_p7, %p160_p8 }
   0xe   : > { %s2405_s6 = smov [#allocation4]  }
   0xf   : > { %s173_s7 = sshll.u32 %s2405_s6, 4  ;;  %p1918_p12 = pneg %p2524_p11  ;;  %s174_s7 = int_to_ptr.vmem [resolvable:$true] %s173_s7 }
  0x10   : > { %s2324_s8 = scalar_lea.vmem %s174_s7, 64  ;;  %p2332_p4 = scmp.lt.s32.totalorder %s174_s7, %s174_s7 }
  0x11   : > { %p1919_p13 = pnand %p1926_p10, %p1918_p12  ;;  %p2325_p1 = scmp.ne.s32.totalorder %s174_s7, %s2324_s8 }
  0x12   : > { %p2333_p9 = scmp.lt.s32.totalorder %s2324_s8, %s2324_s8 }
  0x13   : > { %p2315_p0 = pneg %p1919_p13 }
  0x14   : > { %p2334_p6 = por %p2333_p9, %p2332_p4 }
  0x15   : > { %p2327_p2 = pnand %p2325_p1, %p2315_p0 }
  0x17   : > { %p2328_p3 = pneg %p2327_p2 }
  0x19   : > { %p2335_p7 = pnand %p2334_p6, %p2328_p3 }
  0x1b   : > { %2338 = shalt.err (!%p2335_p7)
}
  0x1c   : > { %1921 = dma.hbm_to_vmem [thread:$0]  (!%p1919_p13), %s3252_s1, 64, %s174_s7, [#allocation5]  }
  0x1d   : > { %204 = sbr.rel (%p2524_p11) target bundleno = 1608 (0x648), region = 40 }
  0x22   : > { %2382 = dma.done.wait (%p1926_p10), [#allocation5], 64  }
  0x23   : > { %2384 = vsyncadd (%p1926_p10), [#allocation5], 4294967232  ;;  %s229_s11 = sand.u32 1, %s2395_s19   ;;  %s1874_s12 = sshll.u32 %s2495_s22, 1 }
  0x24   : > { %s1873_s13 = sshll.u32 %s229_s11, 5  ;;  %p233_p6 = scmp.lt.s32.totalorder %s1874_s12, 3 }
  0x25   : > { %s2548_s23 = scalar_lea.vmem [#allocation7], %s1873_s13  ;;  %p3264_p8 = scmp.ne.s32.totalorder %s2495_s22, 0 }
  0x26   : > { %s3274_s12 = smov (!%p233_p6, %s1874_s12), 3 }
  0x27   : > { %s1875_s14 = sshll.u32 %s3274_s12, 2  ;;  %243 = sbr.rel (%p3264_p8) target bundleno = 50 (0x32), region = 48 }
  0x28   : > { %s236_s17 = scalar_lea.vmem %s3251_s0, %s1875_s14 }
  0x2c   : > { %v2406_v0 = vmov -1e+30  }
  0x2d   : > { %245 = vst [vmem:[#allocation2 + $0x8] sm:$0xff] %v2406_v0  ;;  %246 = vst [vmem:[#allocation2 + $0x10] sm:$0xff] %v2406_v0 }
  0x2e   : > { %247 = vst [vmem:[#allocation2 + $0x18] sm:$0xff] %v2406_v0  ;;  %248 = vst [vmem:[#allocation2 + $0x20] sm:$0xff] %v2406_v0 }
  0x2f   : > { %249 = vst [vmem:[#allocation2 + $0x28] sm:$0xff] %v2406_v0  ;;  %250 = vst [vmem:[#allocation2 + $0x30] sm:$0xff] %v2406_v0 }
  0x30   : > { %252 = vst [vmem:[#allocation3 + $0x30] sm:$0xff] %v2406_v0  ;;  %253 = vst [vmem:[#allocation3] sm:$0xff] %v2406_v0 }
  0x31   : > { %258 = vst [vmem:[#allocation3 + $0x28] sm:$0xff] %v2406_v0  ;;  %259 = vst [vmem:[#allocation3 + $0x38] sm:$0xff] %v2406_v0 }
  0x32 PF: > { %v261_v1 = vld [vmem:[%s236_s17] sm:$0xff]  ;;  %vm277_vm0 = vcmask 1043456   ;;  %v3257_v4 = vmov 0   ;;  %vm273_vm1 = vcmask 64512   ;;  %s2408_s30 = smov 54   ;;  %s2409_s6 = smov 6  }
  0x33   : > { %v1878_v2 = vcombine.high %v261_v1, %v261_v1  ;;  %v1877_v3 = vcombine.low %v261_v1, %v261_v1  ;;  %316 = vmatprep.mubr.bf16.mxu0 %v3257_v4  ;;  %1999 = vset.pattern.permute.xlu0 %v3257_v4  ;;  %v262_v5 = vld [vmem:[%s3253_s2] sm:$0xff]  ;;  %s2410_s7 = smov 66   ;;  %s2411_s8 = smov 18   ;;  %vm365_vm2 = vcmask 48128   ;;  %vm343_vm3 = vcmask 179248  }
  0x34   : > { %265 = vperm.xlu0 %1999, %v262_v5   ;;  %698 = vmatprep.mubr.bf16.mxu1 %v3257_v4  ;;  %v260_v7 = vld [vmem:[#allocation4] sm:$0xf]  ;;  %s2412_s9 = smov 30   ;;  %s2413_s10 = smov 78   ;;  %v434_v26 = vld [vmem:[#allocation2 + $0x8] sm:$0xff]  ;;  %vm370_vm4 = vcmask 277648  }
  0x35   : > { %1879 = vmatprep.subr.msk.bf16.mxu0 %vm277_vm0, %v1878_v2  ;;  %v279_v6 = vsel %vm277_vm0, %v1877_v3, 0  ;;  %s2414_s12 = smov 42   ;;  %s2415_s13 = smov 90   ;;  %vm348_vm5 = vcmask 408848   ;;  %vm353_vm6 = vcmask 638448   ;;  %vm375_vm7 = vcmask 507248  }
  0x36   : > { %299 = vmatpush1.bf16.msra.mxu0 %v279_v6  ;;  %s2416_s14 = smov 114   ;;  %s2417_s15 = smov 126   ;;  %v2567_v25 = vld [vmem:[#allocation2 + $0x30] sm:$0xff]  ;;  %vm358_vm8 = vcmask 868048   ;;  %vm380_vm9 = vcmask 736848   ;;  %vm363_vm10 = vcmask 1048496  }
  0x37   : > { %s2418_s16 = smov 10   ;;  %s2419_s17 = smov 34   ;;  %vm391_vm11 = vcmask 146448   ;;  %vm396_vm12 = vcmask 376048   ;;  %vm401_vm13 = vcmask 605648   ;;  %vm413_vm14 = vcmask 15360  }
  0x38   : > { %s2420_s25 = smov 22   ;;  %s2421_s26 = smov 46   ;;  %vm406_vm15 = vcmask 835248  }
  0x39   : > { %1880 = vmatmul.mubr.msk.bf16.vlgmr.msra.gmra.mxu0 %vm273_vm1, %v260_v7 }
  0x3a   : > { %739 = vmatprep.mubr.bf16.mxu0 %v3257_v4 }
  0xaf   : > { %v266_v8 = vpop.permute.xlu0 %265 }
  0xf9   : > { %v318_v9 = vpop.f32.mrf.mxu0 }
  0xfa   : > { %v319_v10 = vadd.f32 %v318_v9, %v266_v8 }
  0xfb   : > { %v320_v11 = vpop.f32.mrf.mxu0 }
  0xfc   : > { %v1881_v12 = vmul.f32 -1.442695, %v319_v10  ;;  %v321_v15 = vadd.f32 %v320_v11, %v266_v8 }
  0xfd   : > { %v322_v13 = vpop.f32.mrf.mxu0 }
  0xfe   : > { %2285 = vpow2.f32 %v1881_v12  ;;  %v1882_v16 = vmul.f32 -1.442695, %v321_v15 }
  0xff   : > { %v323_v14 = vpop.f32.mrf.mxu0 }
 0x100   : > { %2287 = vpow2.f32 %v1882_v16 }
 0x10b   : > { %v2286_v17 = vpop.eup %2285 }
 0x10c   : > { %v331_v18 = vadd.f32 1.0, %v2286_v17 }
 0x10d   : > { %v2288_v19 = vpop.eup %2287 }
 0x10e   : > { %2289 = vrcp.f32 %v331_v18  ;;  %v332_v20 = vadd.f32 1.0, %v2288_v19 }
 0x110   : > { %2291 = vrcp.f32 %v332_v20 }
 0x11b   : > { %v2290_v21 = vpop.eup %2289 }
 0x11c   : > { %v337_v22 = vmul.f32 %v2290_v21, %v319_v10 }
 0x11d   : > { %v2292_v23 = vpop.eup %2291 }
 0x11e   : > { %360 = vrot.lane.b32.xlu1 %v337_v22, %s2408_s30  ;;  %340 = vrot.lane.b32.xlu0 %v337_v22, %s2409_s6  ;;  %v338_v24 = vmul.f32 %v2292_v23, %v321_v15  ;;  %s2422_s6 = smov 102  }
 0x122   : > { %367 = vrot.lane.b32.xlu1 %v337_v22, %s2410_s7  ;;  %345 = vrot.lane.b32.xlu0 %v337_v22, %s2411_s8  ;;  %s2423_s7 = smov 58   ;;  %s2424_s8 = smov 127  }
 0x126   : > { %350 = vrot.lane.b32.xlu1 %v337_v22, %s2412_s9  ;;  %372 = vrot.lane.b32.xlu0 %v337_v22, %s2413_s10  ;;  %s2425_s9 = smov 1   ;;  %s2426_s10 = smov 2  }
 0x12a   : > { %355 = vrot.lane.b32.xlu1 %v337_v22, %s2414_s12  ;;  %377 = vrot.lane.b32.xlu0 %v337_v22, %s2415_s13  ;;  %s2427_s13 = smov 124  }
 0x12e   : > { %388 = vrot.lane.b32.xlu1 %v338_v24, %s2416_s14  ;;  %393 = vrot.lane.b32.xlu0 %v338_v24, %s2417_s15 }
 0x132   : > { %398 = vrot.lane.b32.xlu1 %v338_v24, %s2418_s16  ;;  %408 = vrot.lane.b32.xlu0 %v338_v24, %s2419_s17  ;;  %s2429_s17 = smov 98  }
 0x136   : > { %403 = vrot.lane.b32.xlu1 %v338_v24, %s2420_s25  ;;  %415 = vrot.lane.b32.xlu0 %v338_v24, %s2421_s26  ;;  %s2430_s25 = smov 70   ;;  %s2431_s26 = smov 82  }
 0x13a   : > { %383 = vrot.lane.b32.xlu1 %v338_v24, %s2422_s6  ;;  %420 = vrot.lane.b32.xlu0 %v338_v24, %s2423_s7  ;;  %s2432_s6 = smov 110   ;;  %s2433_s7 = smov 14  }
 0x13e   : > { %473 = vrot.lane.b32.xlu0 %v2567_v25, %s2424_s8  ;;  %440 = vrot.lane.b32.xlu1 %v434_v26, %s2425_s9 }
 0x142   : > { %488 = vrot.lane.b32.xlu1 %v434_v26, %s2426_s10 }
 0x190   : > { %v361_v27 = vpop.permute.xlu1 %360  ;;  %v341_v28 = vpop.permute.xlu0 %340 }
 0x191   : > { %366 = vst.msk [vmem:[#allocation2 + $0x18] sm:$0xff] %vm365_vm2, %v361_v27  ;;  %vm418_vm2 = vcmask 244848  }
 0x192   : > { %344 = vst.msk [vmem:[#allocation2 + $0x10] sm:$0xff] %vm343_vm3, %v341_v28  ;;  %vm411_vm3 = vcmask 1048464  }
 0x194   : > { %v368_v29 = vpop.permute.xlu1 %367  ;;  %v346_v30 = vpop.permute.xlu0 %345 }
 0x195   : > { %371 = vst.msk [vmem:[#allocation2 + $0x18] sm:$0xff] %vm370_vm4, %v368_v29  ;;  %vm386_vm4 = vcmask 966448  }
 0x196   : > { %349 = vst.msk [vmem:[#allocation2 + $0x10] sm:$0xff] %vm348_vm5, %v346_v30  ;;  %vm423_vm5 = vcmask 474448  }
 0x198   : > { %v351_v31 = vpop.permute.xlu1 %350  ;;  %v373_v32 = vpop.permute.xlu0 %372 }
 0x199   : > { %354 = vst.msk [vmem:[#allocation2 + $0x10] sm:$0xff] %vm353_vm6, %v351_v31  ;;  %vm450_vm6 = vcmask 7168  }
 0x19a   : > { %376 = vst.msk [vmem:[#allocation2 + $0x18] sm:$0xff] %vm375_vm7, %v373_v32  ;;  %vm475_vm7 = vcmask 1039360  }
 0x19c   : > { %v356_v33 = vpop.permute.xlu1 %355  ;;  %v378_v34 = vpop.permute.xlu0 %377 }
 0x19d   : > { %359 = vst.msk [vmem:[#allocation2 + $0x10] sm:$0xff] %vm358_vm8, %v356_v33  ;;  %vm520_vm8 = vcmask 1031168  }
 0x19e   : > { %381 = vst.msk [vmem:[#allocation2 + $0x18] sm:$0xff] %vm380_vm9, %v378_v34  ;;  %vm855_vm9 = vcmask 1014784  }
 0x19f   : > { %364 = vst.msk [vmem:[#allocation2 + $0x10] sm:$0xff] %vm363_vm10, %v361_v27  ;;  %vm917_vm10 = vcmask 211968  }
 0x1a0   : > { %v389_v35 = vpop.permute.xlu1 %388  ;;  %v394_v36 = vpop.permute.xlu0 %393 }
 0x1a1   : > { %392 = vst.msk [vmem:[#allocation2 + $0x20] sm:$0xff] %vm391_vm11, %v389_v35  ;;  %vm944_vm11 = vcmask 801792  }
 0x1a2   : > { %397 = vst.msk [vmem:[#allocation2 + $0x20] sm:$0xff] %vm396_vm12, %v394_v36  ;;  %v2620_v36 = vld [vmem:[#allocation3 + $0x28] sm:$0xff]  ;;  %vm969_vm12 = vcmask 441344  }
 0x1a4   : > { %v399_v37 = vpop.permute.xlu1 %398  ;;  %v409_v38 = vpop.permute.xlu0 %408 }
 0x1a5   : > { %402 = vst.msk [vmem:[#allocation2 + $0x20] sm:$0xff] %vm401_vm13, %v399_v37  ;;  %v2624_v37 = vld [vmem:[#allocation3] sm:$0xff]  ;;  %vm1019_vm13 = vcmask 670720  }
 0x1a6   : > { %414 = vst.msk [vmem:[#allocation2 + $0x28] sm:$0xff] %vm413_vm14, %v409_v38  ;;  %v425_v39 = vld [vmem:[#allocation2 + $0x10] sm:$0xff] }
 0x1a7   : > { %442 = vrot.lane.b32.xlu0 %v425_v39, %s2425_s9 }
 0x1a8   : > { %v404_v40 = vpop.permute.xlu1 %403  ;;  %v416_v41 = vpop.permute.xlu0 %415 }
 0x1a9   : > { %407 = vst.msk [vmem:[#allocation2 + $0x20] sm:$0xff] %vm406_vm15, %v404_v40  ;;  %vm1069_vm15 = vcmask 900096  }
 0x1aa   : > { %419 = vst.msk [vmem:[#allocation2 + $0x28] sm:$0xff] %vm418_vm2, %v416_v41  ;;  %vm994_vm2 = vcmask 572416  }
 0x1ab   : > { %412 = vst.msk [vmem:[#allocation2 + $0x20] sm:$0xff] %vm411_vm3, %v409_v38  ;;  %465 = vrot.lane.b32.xlu0 %v425_v39, %s2424_s8  ;;  %vm1044_vm3 = vcmask 343040  }
 0x1ac   : > { %v384_v42 = vpop.permute.xlu1 %383  ;;  %v421_v43 = vpop.permute.xlu0 %420 }
 0x1ad   : > { %387 = vst.msk [vmem:[#allocation2 + $0x18] sm:$0xff] %vm386_vm4, %v384_v42  ;;  %vm1094_vm4 = vcmask 113664  }
 0x1ae   : > { %424 = vst.msk [vmem:[#allocation2 + $0x28] sm:$0xff] %vm423_vm5, %v421_v43  ;;  %vm1508_vm5 = vcmask 80896  }
 0x1af   : > { %490 = vrot.lane.b32.xlu0 %v425_v39, %s2426_s10 }
 0x1b0   : > { %v474_v47 = vpop.permute.xlu0 %473  ;;  %v441_v50 = vpop.permute.xlu1 %440 }
 0x1b2   : > { %v427_v45 = vld [vmem:[#allocation2 + $0x20] sm:$0xff] }
 0x1b3   : > { %510 = vrot.lane.b32.xlu0 %v425_v39, %s2417_s15 }
 0x1b4   : > { %v426_v44 = vld [vmem:[#allocation2 + $0x18] sm:$0xff]  ;;  %v489_v52 = vpop.permute.xlu1 %488 }
 0x1b5   : > { %444 = vrot.lane.b32.xlu1 %v426_v44, %s2425_s9  ;;  %v428_v46 = vld [vmem:[#allocation2 + $0x28] sm:$0xff] }
 0x1b7   : > { %446 = vrot.lane.b32.xlu0 %v427_v45, %s2425_s9 }
 0x1b9   : > { %448 = vrot.lane.b32.xlu1 %v428_v46, %s2425_s9  ;;  %s2439_s9 = smov 72  }
 0x1bb   : > { %469 = vrot.lane.b32.xlu0 %v427_v45, %s2424_s8 }
 0x1bd   : > { %467 = vrot.lane.b32.xlu1 %v426_v44, %s2424_s8 }
 0x1bf   : > { %494 = vrot.lane.b32.xlu0 %v427_v45, %s2426_s10 }
 0x1c1   : > { %471 = vrot.lane.b32.xlu1 %v428_v46, %s2424_s8  ;;  %s2434_s8 = smov 38  }
 0x1c3   : > { %514 = vrot.lane.b32.xlu0 %v427_v45, %s2417_s15 }
 0x1c5   : > { %492 = vrot.lane.b32.xlu1 %v426_v44, %s2426_s10 }
 0x1c7   : > { %518 = vrot.lane.b32.xlu0 %v2567_v25, %s2417_s15 }
 0x1c9   : > { %496 = vrot.lane.b32.xlu1 %v428_v46, %s2426_s10 }
 0x1cd   : > { %512 = vrot.lane.b32.xlu1 %v426_v44, %s2417_s15 }
 0x1d1   : > { %516 = vrot.lane.b32.xlu1 %v428_v46, %s2417_s15  ;;  %s2428_s15 = smov 26  }
 0x219   : > { %v443_v48 = vpop.permute.xlu0 %442 }
 0x21a   : > { %v451_v60 = vsel %vm450_vm6, %v441_v50, %v443_v48 }
 0x21b   : > { %v459_v1 = vmax.f32 %v425_v39, %v451_v60 }
 0x21d   : > { %v466_v49 = vpop.permute.xlu0 %465 }
 0x221   : > { %v491_v51 = vpop.permute.xlu0 %490 }
 0x222   : > { %v498_v12 = vsel %vm413_vm14, %v489_v52, %v491_v51 }
 0x225   : > { %v511_v53 = vpop.permute.xlu0 %510 }
 0x227   : > { %v445_v54 = vpop.permute.xlu1 %444 }
 0x228   : > { %v452_v63 = vsel %vm450_vm6, %v443_v48, %v445_v54 }
 0x229   : > { %v447_v55 = vpop.permute.xlu0 %446  ;;  %v460_v3 = vmax.f32 %v426_v44, %v452_v63 }
 0x22a   : > { %v453_v7 = vsel %vm450_vm6, %v445_v54, %v447_v55 }
 0x22b   : > { %v449_v56 = vpop.permute.xlu1 %448  ;;  %v461_v15 = vmax.f32 %v427_v45, %v453_v7 }
 0x22c   : > { %v454_v8 = vsel %vm450_vm6, %v447_v55, %v449_v56  ;;  %vm1543_vm6 = vcmask 932864  }
 0x22d   : > { %v470_v58 = vpop.permute.xlu0 %469  ;;  %v462_v16 = vmax.f32 %v428_v46, %v454_v8 }
 0x22f   : > { %v468_v57 = vpop.permute.xlu1 %467 }
 0x230   : > { %v476_v0 = vsel %vm475_vm7, %v466_v49, %v468_v57  ;;  %v477_v2 = vsel %vm475_vm7, %v468_v57, %v470_v58 }
 0x231   : > { %v495_v61 = vpop.permute.xlu0 %494  ;;  %v484_v5 = vmax.f32 %v459_v1, %v476_v0  ;;  %v485_v10 = vmax.f32 %v460_v3, %v477_v2 }
 0x233   : > { %v472_v59 = vpop.permute.xlu1 %471  ;;  %v506_v19 = vmax.f32 %v484_v5, %v498_v12 }
 0x234   : > { %v478_v13 = vsel %vm475_vm7, %v470_v58, %v472_v59  ;;  %v479_v14 = vsel %vm475_vm7, %v472_v59, %v474_v47  ;;  %vm1568_vm7 = vcmask 310272  }
 0x235   : > { %v515_v11 = vpop.permute.xlu0 %514  ;;  %v486_v24 = vmax.f32 %v461_v15, %v478_v13  ;;  %v487_v25 = vmax.f32 %v462_v16, %v479_v14 }
 0x237   : > { %v493_v62 = vpop.permute.xlu1 %492 }
 0x238   : > { %v499_v9 = vsel %vm413_vm14, %v491_v51, %v493_v62  ;;  %v500_v20 = vsel %vm413_vm14, %v493_v62, %v495_v61 }
 0x239   : > { %v507_v17 = vmax.f32 %v485_v10, %v499_v9  ;;  %v519_v28 = vpop.permute.xlu0 %518  ;;  %v508_v29 = vmax.f32 %v486_v24, %v500_v20 }
 0x23b   : > { %v497_v6 = vpop.permute.xlu1 %496 }
 0x23c   : > { %v501_v21 = vsel %vm413_vm14, %v495_v61, %v497_v6 }
 0x23d   : > { %v509_v30 = vmax.f32 %v487_v25, %v501_v21 }
 0x23f   : > { %v513_v18 = vpop.permute.xlu1 %512 }
 0x240   : > { %v521_v22 = vsel %vm520_vm8, %v511_v53, %v513_v18  ;;  %v522_v23 = vsel %vm520_vm8, %v513_v18, %v515_v11 }
 0x241   : > { %v2602_v26 = vmax.f32 %v506_v19, %v521_v22  ;;  %v2604_v27 = vmax.f32 %v507_v17, %v522_v23 }
 0x243   : > { %v517_v31 = vpop.permute.xlu1 %516  ;;  %845 = vrot.lane.b32.xlu1 %v2602_v26, %s2427_s13  ;;  %847 = vrot.lane.b32.xlu0 %v2604_v27, %s2427_s13 }
 0x244   : > { %v523_v32 = vsel %vm520_vm8, %v515_v11, %v517_v31  ;;  %v524_v33 = vsel %vm520_vm8, %v517_v31, %v519_v28  ;;  %v1496_v31 = vld [vmem:[#allocation3 + $0x30] sm:$0xff]  ;;  %vm1593_vm8 = vcmask 703488  }
 0x245   : > { %v2612_v34 = vmax.f32 %v508_v29, %v523_v32  ;;  %v2614_v35 = vmax.f32 %v509_v30, %v524_v33  ;;  %v2725_v30 = vld [vmem:[#allocation3 + $0x38] sm:$0xff]  ;;  %v2100_v32 = vpack.i.bf16 %v2624_v37, %v1496_v31 }
 0x247   : > { %849 = vrot.lane.b32.xlu1 %v2612_v34, %s2427_s13  ;;  %851 = vrot.lane.b32.xlu0 %v2614_v35, %s2427_s13 }
 0x24b   : > { %853 = vrot.lane.b32.xlu1 %v2620_v36, %s2427_s13 }
 0x2b5   : > { %v846_v38 = vpop.permute.xlu1 %845  ;;  %v848_v39 = vpop.permute.xlu0 %847 }
 0x2b6   : > { %v2627_v40 = vmax.f32 %v2624_v37, %v846_v38  ;;  %v856_v41 = vsel %vm855_vm9, %v846_v38, %v848_v39 }
 0x2b7   : > { %v2631_v42 = vmax.f32 %v2602_v26, %v856_v41 }
 0x2b8   : > { %875 = vrot.lane.b32.xlu0 %v2627_v40, %s2426_s10 }
 0x2b9   : > { %v850_v43 = vpop.permute.xlu1 %849  ;;  %877 = vrot.lane.b32.xlu1 %v2631_v42, %s2426_s10  ;;  %v852_v44 = vpop.permute.xlu0 %851 }
 0x2ba   : > { %v857_v45 = vsel %vm855_vm9, %v848_v39, %v850_v43  ;;  %v858_v46 = vsel %vm855_vm9, %v850_v43, %v852_v44 }
 0x2bb   : > { %v2640_v47 = vmax.f32 %v2604_v27, %v857_v45  ;;  %v2643_v48 = vmax.f32 %v2612_v34, %v858_v46 }
 0x2bd   : > { %v854_v49 = vpop.permute.xlu1 %853  ;;  %879 = vrot.lane.b32.xlu0 %v2640_v47, %s2426_s10  ;;  %881 = vrot.lane.b32.xlu1 %v2643_v48, %s2426_s10 }
 0x2be   : > { %v859_v50 = vsel %vm855_vm9, %v852_v44, %v854_v49 }
 0x2bf   : > { %v2651_v51 = vmax.f32 %v2614_v35, %v859_v50 }
 0x2c1   : > { %883 = vrot.lane.b32.xlu0 %v2651_v51, %s2426_s10 }
 0x32a   : > { %v876_v52 = vpop.permute.xlu0 %875 }
 0x32b   : > { %v878_v53 = vpop.permute.xlu1 %877 }
 0x32c   : > { %v885_v54 = vsel %vm413_vm14, %v876_v52, %v878_v53 }
 0x32d   : > { %1241 = vrot.lane.b32.xlu1 %v885_v54, %s2427_s13  ;;  %v2000_v61 = vpack.i.bf16 %v885_v54, %v2624_v37 }
 0x32f   : > { %v882_v55 = vpop.permute.xlu1 %881  ;;  %v880_v56 = vpop.permute.xlu0 %879 }
 0x330   : > { %v886_v57 = vsel %vm413_vm14, %v878_v53, %v880_v56  ;;  %v887_v58 = vsel %vm413_vm14, %v880_v56, %v882_v55 }
 0x331   : > { %1245 = vrot.lane.b32.xlu1 %v887_v58, %s2427_s13  ;;  %1243 = vrot.lane.b32.xlu0 %v886_v57, %s2427_s13  ;;  %v2005_v62 = vpack.i.bf16 %v887_v58, %v886_v57  ;;  %v2015_v0 = vpack.i.bf16 %v886_v57, %v885_v54 }
 0x333   : > { %v884_v59 = vpop.permute.xlu0 %883 }
 0x334   : > { %v888_v60 = vsel %vm413_vm14, %v882_v55, %v884_v59 }
 0x335   : > { %1249 = vrot.lane.b32.xlu1 %v2620_v36, %s2427_s13  ;;  %1247 = vrot.lane.b32.xlu0 %v888_v60, %s2427_s13  ;;  %v2010_v63 = vpack.i.bf16 %v2624_v37, %v888_v60  ;;  %v2020_v1 = vpack.i.bf16 %v888_v60, %v887_v58  ;;  %s1796_s13 = sshll.u32 %s2548_s23, 4  ;;  %s1797_s13 = int_to_ptr.vmem [resolvable:$true] %s1796_s13 }
 0x339   : > { %2001 = vrot.lane.b32.xlu1 %v2000_v61, %s2428_s15  ;;  %2006 = vrot.lane.b32.xlu0 %v2005_v62, %s2428_s15 }
 0x33d   : > { %2011 = vrot.lane.b32.xlu1 %v2010_v63, %s2428_s15  ;;  %2016 = vrot.lane.b32.xlu0 %v2015_v0, %s2429_s17 }
 0x341   : > { %2021 = vrot.lane.b32.xlu1 %v2020_v1, %s2429_s17 }
 0x39f   : > { %v1242_v2 = vpop.permute.xlu1 %1241 }
 0x3a0   : > { %v1260_v3 = vmax.f32 %v2624_v37, %v1242_v2 }
 0x3a2   : > { %1270 = vrot.lane.b32.xlu0 %v1260_v3, %s2426_s10 }
 0x3a3   : > { %v1246_v5 = vpop.permute.xlu1 %1245  ;;  %v1244_v6 = vpop.permute.xlu0 %1243 }
 0x3a4   : > { %v1251_v7 = vsel %vm855_vm9, %v1242_v2, %v1244_v6  ;;  %v1252_v8 = vsel %vm855_vm9, %v1244_v6, %v1246_v5 }
 0x3a5   : > { %v2676_v9 = vmax.f32 %v885_v54, %v1251_v7  ;;  %v2678_v10 = vmax.f32 %v886_v57, %v1252_v8 }
 0x3a7   : > { %v1250_v11 = vpop.permute.xlu1 %1249  ;;  %1274 = vrot.lane.b32.xlu0 %v2678_v10, %s2426_s10  ;;  %1272 = vrot.lane.b32.xlu1 %v2676_v9, %s2426_s10  ;;  %v1248_v12 = vpop.permute.xlu0 %1247 }
 0x3a8   : > { %v1253_v13 = vsel %vm855_vm9, %v1246_v5, %v1248_v12  ;;  %v1254_v15 = vsel %vm855_vm9, %v1248_v12, %v1250_v11  ;;  %vm557_vm9 = vcmask 228352  }
 0x3a9   : > { %v2685_v14 = vmax.f32 %v887_v58, %v1253_v13  ;;  %v2694_v20 = vmax.f32 %v888_v60, %v1254_v15 }
 0x3ab   : > { %v2688_v16 = vpop.permute.xlu1 %2001  ;;  %2031 = vrot.lane.b32.xlu0 %v2005_v62, %s2408_s30  ;;  %1276 = vrot.lane.b32.xlu1 %v2685_v14, %s2426_s10  ;;  %v2007_v17 = vpop.permute.xlu0 %2006 }
 0x3ac   : > { %v2004_v18 = vunpack.i.h.bf16 %v2688_v16  ;;  %v2008_v19 = vunpack.i.l.bf16 %v2007_v17  ;;  %v2009_v23 = vunpack.i.h.bf16 %v2007_v17 }
 0x3ae   : > { %v2699_v21 = vsel %vm917_vm10, %v2004_v18, %v2008_v19  ;;  %v920_v46 = vsel %vm917_vm10, %v2008_v19, %v2009_v23 }
 0x3af   : > { %v2701_v22 = vpop.permute.xlu1 %2011  ;;  %1278 = vrot.lane.b32.xlu0 %v2694_v20, %s2426_s10  ;;  %2026 = vrot.lane.b32.xlu1 %v2000_v61, %s2408_s30  ;;  %v2735_v33 = vpop.permute.xlu0 %2016  ;;  %v930_v54 = vmax.f32 %v2643_v48, %v920_v46 }
 0x3b0   : > { %v3260_v24 = vunpack.i.h.bf16 %v2701_v22  ;;  %v2013_v25 = vunpack.i.l.bf16 %v2701_v22  ;;  %v2019_v57 = vunpack.i.h.bf16 %v2735_v33 }
 0x3b2   : > { %v2710_v28 = vmax.f32 %v1260_v3, %v3260_v24  ;;  %v2713_v29 = vsel %vm917_vm10, %v2009_v23, %v2013_v25 }
 0x3b3   : > { %2041 = vrot.lane.b32.xlu0 %v2015_v0, %s2430_s25  ;;  %2036 = vrot.lane.b32.xlu1 %v2010_v63, %s2408_s30  ;;  %v2737_v39 = vpop.permute.xlu1 %2021 }
 0x3b4   : > { %v2024_v41 = vunpack.i.h.bf16 %v2737_v39  ;;  %v2023_v43 = vunpack.i.l.bf16 %v2737_v39 }
 0x3b6   : > { %v947_v53 = vsel %vm944_vm11, %v2023_v43, %v2024_v41  ;;  %v946_v48 = vsel %vm944_vm11, %v2019_v57, %v2023_v43 }
 0x3b7   : > { %2056 = vrot.lane.b32.xlu0 %v2005_v62, %s2431_s26  ;;  %2046 = vrot.lane.b32.xlu1 %v2020_v1, %s2430_s25 }
 0x3bb   : > { %2066 = vrot.lane.b32.xlu0 %v2015_v0, %s2414_s12  ;;  %2051 = vrot.lane.b32.xlu1 %v2000_v61, %s2431_s26 }
 0x3bf   : > { %2081 = vrot.lane.b32.xlu0 %v2005_v62, %s2432_s6  ;;  %2061 = vrot.lane.b32.xlu1 %v2010_v63, %s2431_s26 }
 0x3c3   : > { %2091 = vrot.lane.b32.xlu0 %v2015_v0, %s2433_s7  ;;  %2071 = vrot.lane.b32.xlu1 %v2020_v1, %s2414_s12  ;;  %v929_v0 = vmax.f32 %v2640_v47, %v2699_v21 }
 0x3c5   : > { %v2772_v7 = vmax.f32 %v929_v0, %v946_v48 }
 0x3c7   : > { %2076 = vrot.lane.b32.xlu1 %v2000_v61, %s2432_s6  ;;  %1541 = vrot.lane.b32.xlu0 %v2725_v30, %s2416_s14  ;;  %v2754_v61 = vmax.f32 %v930_v54, %v947_v53 }
 0x3cb   : > { %2086 = vrot.lane.b32.xlu1 %v2010_v63, %s2432_s6 }
 0x3cf   : > { %2096 = vrot.lane.b32.xlu1 %v2020_v1, %s2433_s7 }
 0x3d3   : > { %2101 = vrot.lane.b32.xlu1 %v2100_v32, %s2418_s16 }
 0x3d7   : > { %2106 = vrot.lane.b32.xlu1 %v2100_v32, %s2434_s8 }
 0x414   : > { %v1271_v38 = vpop.permute.xlu0 %1270 }
 0x419   : > { %v1273_v44 = vpop.permute.xlu1 %1272  ;;  %v1275_v45 = vpop.permute.xlu0 %1274 }
 0x41a   : > { %v1280_v49 = vsel %vm413_vm14, %v1271_v38, %v1273_v44  ;;  %v1281_v50 = vsel %vm413_vm14, %v1273_v44, %v1275_v45 }
 0x41b   : > { %v2744_v52 = vpack.i.bf16 %v1281_v50, %v1280_v49  ;;  %v2120_v62 = vpack.i.bf16 %v1280_v49, %v2620_v36 }
 0x41d   : > { %v1277_v55 = vpop.permute.xlu1 %1276  ;;  %v2032_v56 = vpop.permute.xlu0 %2031  ;;  %2111 = vrot.lane.b32.xlu0 %v2744_v52, %s2428_s15 }
 0x41e   : > { %v1282_v58 = vsel %vm413_vm14, %v1275_v45, %v1277_v55  ;;  %v2034_v59 = vunpack.i.h.bf16 %v2032_v56  ;;  %v2033_v60 = vunpack.i.l.bf16 %v2032_v56 }
 0x41f   : > { %v2125_v17 = vpack.i.bf16 %v1282_v58, %v1281_v50 }
 0x420   : > { %v2761_v63 = vsel %vm969_vm12, %v2033_v60, %v2034_v59 }
 0x421   : > { %v982_v1 = vmax.f32 %v2754_v61, %v2761_v63  ;;  %v2767_v2 = vpop.permute.xlu1 %2026  ;;  %v1279_v3 = vpop.permute.xlu0 %1278  ;;  %2121 = vrot.lane.b32.xlu0 %v2120_v62, %s2429_s17 }
 0x422   : > { %v2029_v5 = vunpack.i.h.bf16 %v2767_v2  ;;  %v1283_v6 = vsel %vm413_vm14, %v1277_v55, %v1279_v3  ;;  %v2028_v48 = vunpack.i.l.bf16 %v2767_v2 }
 0x423   : > { %v2130_v8 = vpack.i.bf16 %v2620_v36, %v1283_v6  ;;  %v2115_v11 = vpack.i.bf16 %v1283_v6, %v1282_v58 }
 0x424   : > { %v2778_v47 = vsel %vm969_vm12, %v2029_v5, %v2033_v60  ;;  %v2260_v60 = vpack.i.bf16 %v2602_v26, %v2624_v37 }
 0x425   : > { %v981_v12 = vmax.f32 %v2772_v7, %v2778_v47  ;;  %v2782_v13 = vpop.permute.xlu1 %2036  ;;  %2131 = vrot.lane.b32.xlu0 %v2130_v8, %s2429_s17  ;;  %2116 = vrot.lane.b32.xlu1 %v2115_v11, %s2428_s15  ;;  %v2790_v21 = vpop.permute.xlu0 %2041  ;;  %v2283_v7 = vld [vmem:[%s3254_s3] ss:$0 sps:$4 sm:$0xff]  }
 0x426   : > { %v2038_v15 = vunpack.i.l.bf16 %v2782_v13  ;;  %v2044_v37 = vunpack.i.h.bf16 %v2790_v21  ;;  %v2043_v3 = vunpack.i.l.bf16 %v2790_v21 }
 0x428   : > { %v2788_v19 = vsel %vm969_vm12, %v2034_v59, %v2038_v15  ;;  %v2003_v59 = vunpack.i.l.bf16 %v2688_v16  ;;  %v970_v16 = vsel %vm969_vm12, %v2028_v48, %v2029_v5 }
 0x429   : > { %v2792_v23 = vpop.permute.xlu1 %2046  ;;  %2136 = vrot.lane.b32.xlu0 %v2744_v52, %s2408_s30  ;;  %2126 = vrot.lane.b32.xlu1 %v2125_v17, %s2429_s17  ;;  %v2801_v31 = vpop.permute.xlu0 %2056  ;;  %s2440_s17 = smov 120  }
 0x42a   : > { %v2059_v38 = vunpack.i.h.bf16 %v2801_v31 }
 0x42d   : > { %v2797_v25 = vpop.permute.xlu1 %2051  ;;  %2146 = vrot.lane.b32.xlu0 %v2120_v62, %s2430_s25  ;;  %2141 = vrot.lane.b32.xlu1 %v2115_v11, %s2408_s30  ;;  %v2814_v45 = vpop.permute.xlu0 %2066  ;;  %s2435_s30 = smov 86  }
 0x431   : > { %v2803_v32 = vpop.permute.xlu1 %2061  ;;  %2156 = vrot.lane.b32.xlu0 %v2130_v8, %s2430_s25  ;;  %2151 = vrot.lane.b32.xlu1 %v2125_v17, %s2430_s25  ;;  %v2825_v50 = vpop.permute.xlu0 %2081 }
 0x432   : > { %v2063_v43 = vunpack.i.l.bf16 %v2803_v32  ;;  %v2084_v54 = vunpack.i.h.bf16 %v2825_v50 }
 0x434   : > { %v2812_v44 = vsel %vm1019_vm13, %v2059_v38, %v2063_v43  ;;  %v2245_v43 = vpack.i.bf16 %v2612_v34, %v2604_v27 }
 0x435   : > { %v2816_v46 = vpop.permute.xlu1 %2071  ;;  %2161 = vrot.lane.b32.xlu0 %v2744_v52, %s2431_s26  ;;  %2166 = vrot.lane.b32.xlu1 %v2115_v11, %s2431_s26  ;;  %v2092_v4 = vpop.permute.xlu0 %2091  ;;  %s1782_s26 = scalar_lea.sflag [#allocation6], %s229_s11 }
 0x439   : > { %v2821_v49 = vpop.permute.xlu1 %2076  ;;  %2171 = vrot.lane.b32.xlu0 %v2120_v62, %s2414_s12  ;;  %2176 = vrot.lane.b32.xlu1 %v2125_v17, %s2414_s12 }
 0x43d   : > { %v2827_v53 = vpop.permute.xlu1 %2086  ;;  %2181 = vrot.lane.b32.xlu0 %v2130_v8, %s2414_s12  ;;  %2191 = vrot.lane.b32.xlu1 %v2115_v11, %s2432_s6  ;;  %s2436_s12 = smov 28   ;;  %v995_v11 = vsel %vm994_vm2, %v2043_v3, %v2044_v37 }
 0x43e   : > { %v2088_v55 = vunpack.i.l.bf16 %v2827_v53 }
 0x440   : > { %v2836_v56 = vsel %vm1069_vm15, %v2084_v54, %v2088_v55  ;;  %v2069_v55 = vunpack.i.h.bf16 %v2814_v45 }
 0x441   : > { %2186 = vrot.lane.b32.xlu0 %v2744_v52, %s2432_s6  ;;  %2201 = vrot.lane.b32.xlu1 %v2125_v17, %s2433_s7  ;;  %s2441_s6 = smov 112  }
 0x445   : > { %2196 = vrot.lane.b32.xlu0 %v2120_v62, %s2433_s7  ;;  %1506 = vrot.lane.b32.xlu1 %v1282_v58, %s2418_s16  ;;  %v2018_v62 = vunpack.i.l.bf16 %v2735_v33  ;;  %v2053_v33 = vunpack.i.l.bf16 %v2797_v25 }
 0x447   : > { %v945_v0 = vsel %vm944_vm11, %v2018_v62, %v2019_v57  ;;  %v3259_v57 = vunpack.i.h.bf16 %v2792_v23 }
 0x449   : > { %2206 = vrot.lane.b32.xlu0 %v2130_v8, %s2433_s7  ;;  %2221 = vrot.lane.b32.xlu1 %v2130_v8, %s2416_s14 }
 0x44d   : > { %2211 = vrot.lane.b32.xlu0 %v2744_v52, %s2418_s16  ;;  %1566 = vrot.lane.b32.xlu1 %v1282_v58, %s2434_s8  ;;  %v918_v58 = vsel %vm917_vm10, %v2003_v59, %v2004_v18  ;;  %v2054_v18 = vunpack.i.h.bf16 %v2797_v25  ;;  %s2438_s16 = smov 56  }
 0x44e   : > { %v928_v6 = vmax.f32 %v2631_v42, %v918_v58  ;;  %v2255_v42 = vpack.i.bf16 %v2614_v35, %v2612_v34  ;;  %v2068_v58 = vunpack.i.l.bf16 %v2814_v45 }
 0x44f   : > { %v1020_v2 = vsel %vm1019_vm13, %v2053_v33, %v2054_v18 }
 0x451   : > { %2216 = vrot.lane.b32.xlu0 %v2125_v17, %s2416_s14  ;;  %2236 = vrot.lane.b32.xlu1 %v2130_v8, %s2435_s30  ;;  %v2048_v8 = vunpack.i.l.bf16 %v2792_v23  ;;  %s2437_s14 = smov 100  }
 0x455   : > { %2226 = vrot.lane.b32.xlu0 %v2744_v52, %s2434_s8  ;;  %2241 = vrot.lane.b32.xlu1 %v2260_v60, %s2436_s12  ;;  %v955_v52 = vmax.f32 %v928_v6, %v945_v0  ;;  %v2078_v0 = vunpack.i.l.bf16 %v2821_v49  ;;  %v927_v6 = vmax.f32 %v2627_v40, %v2003_v59  ;;  %v2250_v40 = vpack.i.bf16 %v2604_v27, %v2602_v26 }
 0x456   : > { %v1045_v59 = vsel %vm1044_vm3, %v2068_v58, %v2069_v55 }
 0x457   : > { %v980_v15 = vmax.f32 %v955_v52, %v970_v16  ;;  %v2058_v52 = vunpack.i.l.bf16 %v2801_v31  ;;  %v954_v45 = vmax.f32 %v927_v6, %v2018_v62  ;;  %v2093_v62 = vunpack.i.l.bf16 %v2092_v4 }
 0x459   : > { %2231 = vrot.lane.b32.xlu0 %v2125_v17, %s2435_s30  ;;  %555 = vrot.lane.b32.xlu1 %v2614_v35, %s2436_s12  ;;  %v1005_v5 = vmax.f32 %v980_v15, %v995_v11  ;;  %v997_v17 = vsel %vm994_vm2, %v2048_v8, %v3259_v57  ;;  %v2074_v11 = vunpack.i.h.bf16 %v2816_v46  ;;  %v2073_v15 = vunpack.i.l.bf16 %v2816_v46  ;;  %v2907_v57 = vpop.permute.xlu1 %2096 }
 0x45a   : > { %v1022_v61 = vsel %vm1019_vm13, %v2058_v52, %v2059_v38  ;;  %v1021_v21 = vsel %vm1019_vm13, %v2054_v18, %v2058_v52 }
 0x45b   : > { %v1030_v16 = vmax.f32 %v1005_v5, %v1020_v2  ;;  %v1047_v63 = vsel %vm1044_vm3, %v2073_v15, %v2074_v11 }
 0x45d   : > { %1591 = vrot.lane.b32.xlu0 %v2725_v30, %s2435_s30  ;;  %2256 = vrot.lane.b32.xlu1 %v2255_v42, %s2437_s14  ;;  %v2079_v30 = vunpack.i.h.bf16 %v2821_v49  ;;  %v1007_v49 = vmax.f32 %v982_v1, %v997_v17  ;;  %v1055_v5 = vmax.f32 %v1030_v16, %v1045_v59  ;;  %v2094_v1 = vunpack.i.h.bf16 %v2092_v4  ;;  %v2282_v4 = vld [vmem:[%s3254_s3] ss:$0 sps:$4 sm:$0xff]   ;;  %s2442_s30 = smov 104  }
 0x45e   : > { %v2083_v16 = vunpack.i.l.bf16 %v2825_v50  ;;  %v2098_v59 = vunpack.i.l.bf16 %v2907_v57 }
 0x45f   : > { %v1070_v2 = vsel %vm1069_vm15, %v2078_v0, %v2079_v30  ;;  %v1095_v38 = vsel %vm1094_vm4, %v2093_v62, %v2094_v1 }
 0x460   : > { %v1080_v6 = vmax.f32 %v1055_v5, %v1070_v2  ;;  %v1046_v5 = vsel %vm1044_vm3, %v2069_v55, %v2073_v15  ;;  %v1096_v18 = vsel %vm1094_vm4, %v2094_v1, %v2098_v59 }
 0x461   : > { %2246 = vrot.lane.b32.xlu0 %v2245_v43, %s2436_s12  ;;  %2261 = vrot.lane.b32.xlu1 %v2260_v60, %s2438_s16  ;;  %v979_v60 = vmax.f32 %v954_v45, %v2028_v48  ;;  %v1032_v48 = vmax.f32 %v1007_v49, %v1022_v61  ;;  %v2099_v45 = vunpack.i.h.bf16 %v2907_v57  ;;  %v996_v49 = vsel %vm994_vm2, %v2044_v37, %v2048_v8 }
 0x462   : > { %v1006_v50 = vmax.f32 %v981_v12, %v996_v49  ;;  %v3265_v49 = vunpack.i.h.bf16 %v2701_v22 }
 0x463   : > { %v1004_v17 = vmax.f32 %v979_v60, %v2043_v3  ;;  %v1057_v31 = vmax.f32 %v1032_v48, %v1047_v63  ;;  %v1105_v3 = vmax.f32 %v1080_v6, %v1095_v38  ;;  %v1097_v2 = vsel %vm1094_vm4, %v2098_v59, %v2099_v45 }
 0x464   : > { %v1031_v61 = vmax.f32 %v1006_v50, %v1021_v21 }
 0x465   : > { %2251 = vrot.lane.b32.xlu0 %v2250_v40, %s2437_s14  ;;  %603 = vrot.lane.b32.xlu1 %v2614_v35, %s2438_s16  ;;  %v1029_v24 = vmax.f32 %v1004_v17, %v2053_v33  ;;  %v1072_v33 = vsel %vm1069_vm15, %v2083_v16, %v2084_v54  ;;  %v1111_v8 = vpack.c.bf16 %v1105_v3, %v1105_v3 }
 0x466   : > { %v1082_v60 = vmax.f32 %v1057_v31, %v1072_v33 }
 0x468   : > { %v1107_v54 = vmax.f32 %v1082_v60, %v1097_v2 }
 0x469   : > { %580 = vrot.lane.b32.xlu0 %v2620_v36, %s2437_s14  ;;  %2276 = vrot.lane.b32.xlu1 %v2255_v42, %s2439_s9  ;;  %v1054_v42 = vmax.f32 %v1029_v24, %v2068_v58  ;;  %v1071_v24 = vsel %vm1069_vm15, %v2079_v30, %v2083_v16  ;;  %v2954_v30 = vpop.permute.xlu0 %1541  ;;  %v2039_v16 = vunpack.i.h.bf16 %v2782_v13 }
 0x46a   : > { %v1113_v25 = vpack.c.bf16 %v1107_v54, %v1107_v54 }
 0x46b   : > { %v1079_v37 = vmax.f32 %v1054_v42, %v2078_v0  ;;  %v2956_v0 = vpop.permute.xlu1 %2101 }
 0x46d   : > { %2266 = vrot.lane.b32.xlu0 %v2245_v43, %s2438_s16  ;;  %649 = vrot.lane.b32.xlu1 %v2282_v4, %s2440_s17  ;;  %v1056_v43 = vmax.f32 %v1031_v61, %v1046_v5  ;;  %v1104_v58 = vmax.f32 %v1079_v37, %v2093_v62  ;;  %v931_v62 = vmax.f32 %v2651_v51, %v2713_v29  ;;  %v3266_v37 = vunpack.i.h.bf16 %v2792_v23 }
 0x46f   : > { %v1081_v52 = vmax.f32 %v1056_v43, %v1071_v24  ;;  %v1110_v47 = vpack.c.bf16 %v1104_v58, %v1104_v58  ;;  %v2960_v15 = vpop.permute.xlu1 %2106 }
 0x471   : > { %2271 = vrot.lane.b32.xlu0 %v2250_v40, %s2439_s9  ;;  %1127 = vrot.lane.b32.xlu1 %v1111_v8, %s2426_s10  ;;  %v1106_v12 = vmax.f32 %v1081_v52, %v1096_v18 }
 0x473   : > { %v1112_v55 = vpack.c.bf16 %v1106_v12, %v1106_v12 }
 0x475   : > { %626 = vrot.lane.b32.xlu0 %v2620_v36, %s2439_s9  ;;  %1131 = vrot.lane.b32.xlu1 %v1113_v25, %s2426_s10  ;;  %s1911_s9 = sshll.u32 %s2495_s22, 9  ;;  %s2443_s22 = smov [#allocation7]  }
 0x476   : > { %s1794_s25 = scalar_lea.hbm %s3256_s5, %s1911_s9  ;;  %s2343_s7 = sshll.u32 %s2443_s22, 4  ;;  %s2344_s7 = int_to_ptr.vmem [resolvable:$false] %s2343_s7 }
 0x477   : > { %s2345_s8 = scalar_lea.vmem %s2344_s7, 1024  ;;  %p2346_p12 = scmp.lt.s32.totalorder %s1797_s13, %s2344_s7 }
 0x479   : > { %1125 = vrot.lane.b32.xlu0 %v1110_v47, %s2426_s10  ;;  %1118 = vrot.lane.b32.xlu1 %v2283_v7, %s2441_s6  ;;  %s2339_s6 = scalar_lea.vmem %s1797_s13, 512 }
 0x47a   : > { %p2340_p9 = scmp.ne.s32.totalorder %s1797_s13, %s2339_s6  ;;  %p2347_p13 = scmp.lt.s32.totalorder %s2345_s8, %s2339_s6 }
 0x47c   : > { %p2341_p10 = pnand %p2340_p9, %p2512_p5  ;;  %p2348_p0 = por %p2347_p13, %p2346_p12 }
 0x47d   : > { %1129 = vrot.lane.b32.xlu0 %v1112_v55, %s2426_s10 }
 0x47e   : > { %p2342_p11 = pneg %p2341_p10 }
 0x480   : > { %p2349_p1 = pnand %p2348_p0, %p2342_p11 }
 0x48f   : > { %v2958_v36 = vpop.permute.xlu0 %2111 }
 0x490   : > { %v2113_v17 = vunpack.i.l.bf16 %v2958_v36  ;;  %v2114_v12 = vunpack.i.h.bf16 %v2958_v36 }
 0x492   : > { %v1312_v51 = vsel %vm917_vm10, %v3265_v49, %v2113_v17 }
 0x493   : > { %v2122_v40 = vpop.permute.xlu0 %2121  ;;  %v1322_v13 = vmax.f32 %v2676_v9, %v1312_v51  ;;  %v2064_v9 = vunpack.i.h.bf16 %v2803_v32  ;;  %v2089_v51 = vunpack.i.h.bf16 %v2827_v53 }
 0x494   : > { %v2124_v63 = vunpack.i.h.bf16 %v2122_v40  ;;  %v2123_v1 = vunpack.i.l.bf16 %v2122_v40 }
 0x496   : > { %v1347_v48 = vmax.f32 %v2710_v28, %v2124_v63  ;;  %v948_v6 = vsel %vm944_vm11, %v2024_v41, %v2123_v1 }
 0x497   : > { %v958_v59 = vmax.f32 %v931_v62, %v948_v6  ;;  %v2117_v31 = vpop.permute.xlu1 %2116  ;;  %v2970_v4 = vpop.permute.xlu0 %2131 }
 0x498   : > { %v1371_v3 = vmax.f32 %v1347_v48, %v2039_v16  ;;  %v2119_v7 = vunpack.i.h.bf16 %v2117_v31  ;;  %v2118_v32 = vunpack.i.l.bf16 %v2117_v31  ;;  %v2134_v31 = vunpack.i.h.bf16 %v2970_v4 }
 0x499   : > { %v983_v38 = vmax.f32 %v958_v59, %v2788_v19  ;;  %v1313_v59 = vsel %vm917_vm10, %v2113_v17, %v2114_v12  ;;  %v2133_v36 = vunpack.i.l.bf16 %v2970_v4 }
 0x49a   : > { %v1315_v62 = vsel %vm917_vm10, %v2118_v32, %v2119_v7  ;;  %v1314_v17 = vsel %vm917_vm10, %v2114_v12, %v2118_v32  ;;  %vm582_vm10 = vcmask 818176  }
 0x49b   : > { %v2976_v29 = vpop.permute.xlu1 %2126  ;;  %v2978_v28 = vpop.permute.xlu0 %2136 }
 0x49c   : > { %v2128_v39 = vunpack.i.l.bf16 %v2976_v29  ;;  %v2138_v41 = vunpack.i.l.bf16 %v2978_v28  ;;  %v2129_v48 = vunpack.i.h.bf16 %v2976_v29 }
 0x49e   : > { %v1338_v33 = vsel %vm944_vm11, %v2124_v63, %v2128_v39  ;;  %v1362_v22 = vsel %vm969_vm12, %v2039_v16, %v2138_v41  ;;  %v1339_v4 = vsel %vm944_vm11, %v2128_v39, %v2129_v48 }
 0x49f   : > { %v1348_v2 = vmax.f32 %v1322_v13, %v1338_v33  ;;  %v2984_v42 = vpop.permute.xlu1 %2141  ;;  %v2147_v19 = vpop.permute.xlu0 %2146  ;;  %v1325_v13 = vmax.f32 %v2694_v20, %v1315_v62 }
 0x4a0   : > { %v2149_v60 = vunpack.i.h.bf16 %v2147_v19  ;;  %v2148_v21 = vunpack.i.l.bf16 %v2147_v19  ;;  %v2144_v19 = vunpack.i.h.bf16 %v2984_v42  ;;  %v2143_v46 = vunpack.i.l.bf16 %v2984_v42 }
 0x4a1   : > { %v1372_v50 = vmax.f32 %v1348_v2, %v1362_v22  ;;  %v2139_v22 = vunpack.i.h.bf16 %v2978_v28  ;;  %v2104_v42 = vunpack.i.h.bf16 %v2956_v0 }
 0x4a2   : > { %v998_v54 = vsel %vm994_vm2, %v3266_v37, %v2148_v21  ;;  %v1395_v8 = vmax.f32 %v1371_v3, %v2149_v60 }
 0x4a3   : > { %v1008_v5 = vmax.f32 %v983_v38, %v998_v54  ;;  %v2993_v61 = vpop.permute.xlu1 %2151  ;;  %v2995_v24 = vpop.permute.xlu0 %2156  ;;  %v1364_v32 = vsel %vm969_vm12, %v2139_v22, %v2143_v46 }
 0x4a4   : > { %v2153_v43 = vunpack.i.l.bf16 %v2993_v61  ;;  %v1419_v25 = vmax.f32 %v1395_v8, %v2064_v9  ;;  %v2159_v21 = vunpack.i.h.bf16 %v2995_v24 }
 0x4a5   : > { %v1033_v58 = vmax.f32 %v1008_v5, %v2812_v44  ;;  %v1365_v5 = vsel %vm969_vm12, %v2143_v46, %v2144_v19 }
 0x4a6   : > { %v1386_v18 = vsel %vm994_vm2, %v2149_v60, %v2153_v43  ;;  %v1341_v60 = vsel %vm944_vm11, %v2133_v36, %v2134_v31 }
 0x4a7   : > { %v3002_v23 = vpop.permute.xlu1 %2166  ;;  %v3004_v52 = vpop.permute.xlu0 %2161  ;;  %v1396_v55 = vmax.f32 %v1372_v50, %v1386_v18  ;;  %v2158_v50 = vunpack.i.l.bf16 %v2995_v24  ;;  %v1351_v37 = vmax.f32 %v1325_v13, %v1341_v60 }
 0x4a8   : > { %v2163_v47 = vunpack.i.l.bf16 %v3004_v52  ;;  %v2169_v18 = vunpack.i.h.bf16 %v3002_v23 }
 0x4a9   : > { %v1389_v12 = vsel %vm994_vm2, %v2158_v50, %v2159_v21  ;;  %v1375_v62 = vmax.f32 %v1351_v37, %v1365_v5 }
 0x4aa   : > { %v1410_v44 = vsel %vm1019_vm13, %v2064_v9, %v2163_v47  ;;  %v1340_v9 = vsel %vm944_vm11, %v2129_v48, %v2133_v36  ;;  %vm605_vm11 = vcmask 457728  }
 0x4ab   : > { %v1420_v40 = vmax.f32 %v1396_v55, %v1410_v44  ;;  %v3011_v63 = vpop.permute.xlu1 %2176  ;;  %v2172_v1 = vpop.permute.xlu0 %2171  ;;  %v2164_v55 = vunpack.i.h.bf16 %v3004_v52  ;;  %v1399_v36 = vmax.f32 %v1375_v62, %v1389_v12 }
 0x4ac   : > { %v2174_v6 = vunpack.i.h.bf16 %v2172_v1  ;;  %v2173_v16 = vunpack.i.l.bf16 %v2172_v1  ;;  %v2178_v38 = vunpack.i.l.bf16 %v3011_v63 }
 0x4ae   : > { %v1048_v3 = vsel %vm1044_vm3, %v2074_v11, %v2173_v16  ;;  %v1443_v49 = vmax.f32 %v1419_v25, %v2174_v6  ;;  %v1323_v11 = vmax.f32 %v2678_v10, %v1313_v59  ;;  %v1434_v39 = vsel %vm1044_vm3, %v2174_v6, %v2178_v38 }
 0x4af   : > { %v1058_v29 = vmax.f32 %v1033_v58, %v1048_v3  ;;  %v3024_v33 = vpop.permute.xlu1 %2191  ;;  %v3026_v2 = vpop.permute.xlu0 %2181  ;;  %v1324_v10 = vmax.f32 %v2685_v14, %v1314_v17  ;;  %v2154_v58 = vunpack.i.h.bf16 %v2993_v61  ;;  %v1363_v25 = vsel %vm969_vm12, %v2138_v41, %v2139_v22 }
 0x4b0   : > { %v3035_v20 = vmax.f32 %v1443_v49, %v2089_v51  ;;  %v1349_v54 = vmax.f32 %v1323_v11, %v1339_v4  ;;  %v2168_v14 = vunpack.i.l.bf16 %v3002_v23  ;;  %v3055_v7 = vmax.f32 %v1420_v40, %v1434_v39 }
 0x4b1   : > { %v1083_v53 = vmax.f32 %v1058_v29, %v2836_v56  ;;  %v1350_v1 = vmax.f32 %v1324_v10, %v1340_v9  ;;  %v1387_v40 = vsel %vm994_vm2, %v2153_v43, %v2154_v58  ;;  %v1388_v6 = vsel %vm994_vm2, %v2154_v58, %v2158_v50 }
 0x4b2   : > { %v1373_v28 = vmax.f32 %v1349_v54, %v1363_v25  ;;  %v2179_v16 = vunpack.i.h.bf16 %v3011_v63  ;;  %v1413_v3 = vsel %vm1019_vm13, %v2168_v14, %v2169_v18  ;;  %v2183_v49 = vunpack.i.l.bf16 %v3026_v2 }
 0x4b3   : > { %v3045_v8 = vpop.permute.xlu1 %2201  ;;  %v2187_v56 = vpop.permute.xlu0 %2186  ;;  %v1374_v31 = vmax.f32 %v1350_v1, %v1364_v32  ;;  %v2184_v13 = vunpack.i.h.bf16 %v3026_v2  ;;  %v2103_v29 = vunpack.i.l.bf16 %v2956_v0  ;;  %v1423_v22 = vmax.f32 %v1399_v36, %v1413_v3 }
 0x4b4   : > { %v2188_v24 = vunpack.i.l.bf16 %v2187_v56  ;;  %v2189_v61 = vunpack.i.h.bf16 %v2187_v56  ;;  %v1397_v17 = vmax.f32 %v1373_v28, %v1387_v40  ;;  %v1412_v52 = vsel %vm1019_vm13, %v2164_v55, %v2168_v14 }
 0x4b5   : > { %v1398_v4 = vmax.f32 %v1374_v31, %v1388_v6  ;;  %v2193_v57 = vunpack.i.l.bf16 %v3024_v33  ;;  %v2203_v50 = vunpack.i.l.bf16 %v3045_v8  ;;  %v2204_v54 = vunpack.i.h.bf16 %v3045_v8 }
 0x4b6   : > { %v3061_v44 = vsel %vm1069_vm15, %v2089_v51, %v2188_v24  ;;  %v1411_v51 = vsel %vm1019_vm13, %v2163_v47, %v2164_v55  ;;  %v1435_v47 = vsel %vm1044_vm3, %v2178_v38, %v2179_v16  ;;  %v1459_v39 = vsel %vm1069_vm15, %v2188_v24, %v2189_v61 }
 0x4b7   : > { %v1468_v41 = vmax.f32 %v3055_v7, %v3061_v44  ;;  %v3065_v48 = vpop.permute.xlu1 %1506  ;;  %v2197_v23 = vpop.permute.xlu0 %2196  ;;  %v1421_v60 = vmax.f32 %v1397_v17, %v1411_v51  ;;  %v1422_v37 = vmax.f32 %v1398_v4, %v1412_v52  ;;  %v2194_v38 = vunpack.i.h.bf16 %v3024_v33 }
 0x4b8   : > { %v2198_v59 = vunpack.i.l.bf16 %v2197_v23  ;;  %v2199_v2 = vunpack.i.h.bf16 %v2197_v23  ;;  %v1460_v5 = vsel %vm1069_vm15, %v2189_v61, %v2193_v57  ;;  %v1509_v33 = vsel %vm1508_vm5, %v2103_v29, %v2104_v42 }
 0x4b9   : > { %v1445_v63 = vmax.f32 %v1421_v60, %v1435_v47  ;;  %v2109_v8 = vunpack.i.h.bf16 %v2960_v15  ;;  %v2108_v44 = vunpack.i.l.bf16 %v2960_v15  ;;  %v1461_v1 = vsel %vm1069_vm15, %v2193_v57, %v2194_v38 }
 0x4ba   : > { %v1098_v43 = vsel %vm1094_vm4, %v2099_v45, %v2198_v59  ;;  %v1436_v45 = vsel %vm1044_vm3, %v2179_v16, %v2183_v49  ;;  %v1482_v58 = vsel %vm1094_vm4, %v2199_v2, %v2203_v50  ;;  %v1491_v12 = vmax.f32 %v3035_v20, %v2199_v2 }
 0x4bb   : > { %v1108_v19 = vmax.f32 %v1083_v53, %v1098_v43  ;;  %v3082_v46 = vpop.permute.xlu1 %2221  ;;  %v2207_v11 = vpop.permute.xlu0 %2206  ;;  %v1437_v53 = vsel %vm1044_vm3, %v2183_v49, %v2184_v13  ;;  %v1446_v14 = vmax.f32 %v1422_v37, %v1436_v45  ;;  %v1469_v7 = vmax.f32 %v1445_v63, %v1459_v39 }
 0x4bc   : > { %v2208_v10 = vunpack.i.l.bf16 %v2207_v11  ;;  %v1447_v24 = vmax.f32 %v1423_v22, %v1437_v53  ;;  %v2209_v32 = vunpack.i.h.bf16 %v2207_v11  ;;  %v1492_v62 = vmax.f32 %v1468_v41, %v1482_v58 }
 0x4bd   : > { %v1114_v21 = vpack.c.bf16 %v1108_v19, %v1108_v19  ;;  %v1470_v28 = vmax.f32 %v1446_v14, %v1460_v5  ;;  %v1483_v6 = vsel %vm1094_vm4, %v2203_v50, %v2204_v54  ;;  %v2224_v51 = vunpack.i.h.bf16 %v3082_v46 }
 0x4be   : > { %v1484_v55 = vsel %vm1094_vm4, %v2204_v54, %v2208_v10  ;;  %v1471_v36 = vmax.f32 %v1447_v24, %v1461_v1  ;;  %v1485_v3 = vsel %vm1094_vm4, %v2208_v10, %v2209_v32  ;;  %v1493_v49 = vmax.f32 %v1469_v7, %v1483_v6 }
 0x4bf   : > { %v3095_v56 = vpop.permute.xlu1 %1566  ;;  %v2212_v9 = vpop.permute.xlu0 %2211  ;;  %1133 = vrot.lane.b32.xlu0 %v1114_v21, %s2426_s10  ;;  %v1494_v20 = vmax.f32 %v1470_v28, %v1484_v55  ;;  %v2223_v15 = vunpack.i.l.bf16 %v3082_v46  ;;  %v1518_v13 = vmax.f32 %v1491_v12, %v2103_v29  ;;  %v1519_v4 = vmax.f32 %v1492_v62, %v1509_v33 }
 0x4c0   : > { %v2214_v25 = vunpack.i.h.bf16 %v2212_v9  ;;  %v2213_v18 = vunpack.i.l.bf16 %v2212_v9  ;;  %v1495_v22 = vmax.f32 %v1471_v36, %v1485_v3  ;;  %v1569_v29 = vsel %vm1568_vm7, %v2108_v44, %v2109_v8 }
 0x4c1   : > { %v1547_v24 = vsel %vm1543_vm6, %v2224_v51, %v2954_v30  ;;  %vm628_vm12 = vcmask 588800  }
 0x4c2   : > { %v1511_v16 = vsel %vm1508_vm5, %v2213_v18, %v2214_v25  ;;  %v1512_v61 = vsel %vm1508_vm5, %v2214_v25, %v3065_v48  ;;  %v1510_v43 = vsel %vm1508_vm5, %v2104_v42, %v2213_v18  ;;  %v1546_v48 = vsel %vm1543_vm6, %v2223_v15, %v2224_v51 }
 0x4c3   : > { %v2237_v23 = vpop.permute.xlu1 %2236  ;;  %v2217_v40 = vpop.permute.xlu0 %2216  ;;  %v1521_v17 = vmax.f32 %v1494_v20, %v1511_v16  ;;  %v1520_v57 = vmax.f32 %v1493_v49, %v1510_v43  ;;  %v1522_v0 = vmax.f32 %v1495_v22, %v1512_v61  ;;  %v1739_v22 = vld [vmem:[%s3255_s4] sm:$0xff] }
 0x4c4   : > { %v2219_v59 = vunpack.i.h.bf16 %v2217_v40  ;;  %v2218_v31 = vunpack.i.l.bf16 %v2217_v40  ;;  %v2239_v45 = vunpack.i.h.bf16 %v2237_v23  ;;  %v2238_v21 = vunpack.i.l.bf16 %v2237_v23 }
 0x4c5   : > { %v1556_v53 = vmax.f32 %v1521_v17, %v1546_v48  ;;  %v1557_v55 = vmax.f32 %v1522_v0, %v1547_v24 }
 0x4c6   : > { %v1544_v41 = vsel %vm1543_vm6, %v2218_v31, %v2219_v59  ;;  %v1553_v52 = vmax.f32 %v1518_v13, %v2218_v31  ;;  %v1545_v46 = vsel %vm1543_vm6, %v2219_v59, %v2223_v15  ;;  %v1596_v1 = vsel %vm1593_vm8, %v2238_v21, %v2239_v45  ;;  %v2284_v15 = vld [vmem:[%s3254_s3] ss:$0 sps:$4 sm:$0xff]  }
 0x4c7   : > { %v3119_v19 = vpop.permute.xlu1 %2241  ;;  %v2227_v11 = vpop.permute.xlu0 %2226  ;;  %v1554_v60 = vmax.f32 %v1519_v4, %v1544_v41  ;;  %v1555_v37 = vmax.f32 %v1520_v57, %v1545_v46 }
 0x4c8   : > { %v2229_v47 = vunpack.i.h.bf16 %v2227_v11  ;;  %v2228_v2 = vunpack.i.l.bf16 %v2227_v11  ;;  %v1578_v54 = vmax.f32 %v1553_v52, %v2108_v44  ;;  %v2244_v3 = vunpack.i.h.bf16 %v3119_v19 }
 0x4c9   : > { %v1579_v9 = vmax.f32 %v1554_v60, %v1569_v29  ;;  %v2243_v20 = vunpack.i.l.bf16 %v3119_v19 }
 0x4ca   : > { %v1571_v42 = vsel %vm1568_vm7, %v2228_v2, %v2229_v47  ;;  %v1570_v50 = vsel %vm1568_vm7, %v2109_v8, %v2228_v2  ;;  %v1572_v33 = vsel %vm1568_vm7, %v2229_v47, %v3095_v56 }
 0x4cb   : > { %v3126_v39 = vpop.permute.xlu1 %555  ;;  %v2232_v10 = vpop.permute.xlu0 %2231  ;;  %v1581_v5 = vmax.f32 %v1556_v53, %v1571_v42  ;;  %v1580_v58 = vmax.f32 %v1555_v37, %v1570_v50  ;;  %v1582_v40 = vmax.f32 %v1557_v55, %v1572_v33  ;;  %v558_v19 = vsel %vm557_vm9, %v2243_v20, %v2244_v3  ;;  %v2310_v20 = vld [vmem:[#allocation2 + $0x10] sm:$0xff] }
 0x4cc   : > { %v2234_v63 = vunpack.i.h.bf16 %v2232_v10  ;;  %v2233_v38 = vunpack.i.l.bf16 %v2232_v10  ;;  %v566_v2 = vmax.f32 %v2602_v26, %v558_v19 }
 0x4cd   : > { %v1606_v23 = vmax.f32 %v1581_v5, %v1596_v1 }
 0x4ce   : > { %v1603_v25 = vmax.f32 %v1578_v54, %v2233_v38  ;;  %v1594_v18 = vsel %vm1593_vm8, %v2233_v38, %v2234_v63  ;;  %v1595_v14 = vsel %vm1593_vm8, %v2234_v63, %v2238_v21 }
 0x4cf   : > { %v3130_v7 = vpop.permute.xlu1 %2256  ;;  %v1592_v32 = vpop.permute.xlu0 %1591  ;;  %v1604_v8 = vmax.f32 %v1579_v9, %v1594_v18  ;;  %v1605_v44 = vmax.f32 %v1580_v58, %v1595_v14  ;;  %v1612_v31 = vpack.c.bf16 %v1606_v23, %v1606_v23 }
 0x4d0   : > { %v1609_v12 = vpack.c.bf16 %v1603_v25, %v1603_v25  ;;  %v1597_v28 = vsel %vm1593_vm8, %v2239_v45, %v1592_v32  ;;  %v2259_v41 = vunpack.i.h.bf16 %v3130_v7  ;;  %v2258_v61 = vunpack.i.l.bf16 %v3130_v7 }
 0x4d1   : > { %v1610_v62 = vpack.c.bf16 %v1604_v8, %v1604_v8  ;;  %v1607_v30 = vmax.f32 %v1582_v40, %v1597_v28  ;;  %v1611_v59 = vpack.c.bf16 %v1605_v44, %v1605_v44 }
 0x4d2   : > { %1624 = vrot.lane.b32.xlu0 %v1609_v12, %s2426_s10  ;;  %v585_v46 = vsel %vm582_vm10, %v2258_v61, %v2259_v41 }
 0x4d3   : > { %v2262_v6 = vpop.permute.xlu1 %2261  ;;  %v2247_v16 = vpop.permute.xlu0 %2246  ;;  %1626 = vrot.lane.b32.xlu1 %v1610_v62, %s2426_s10  ;;  %v1613_v13 = vpack.c.bf16 %v1607_v30, %v1607_v30 }
 0x4d4   : > { %v2249_v36 = vunpack.i.h.bf16 %v2247_v16  ;;  %v2248_v56 = vunpack.i.l.bf16 %v2247_v16  ;;  %v2264_v48 = vunpack.i.h.bf16 %v2262_v6  ;;  %v2263_v57 = vunpack.i.l.bf16 %v2262_v6 }
 0x4d6   : > { %1628 = vrot.lane.b32.xlu0 %v1611_v59, %s2426_s10  ;;  %v560_v43 = vsel %vm557_vm9, %v2248_v56, %v2249_v36  ;;  %v559_v29 = vsel %vm557_vm9, %v2244_v3, %v2248_v56  ;;  %v561_v0 = vsel %vm557_vm9, %v2249_v36, %v3126_v39  ;;  %v606_v25 = vsel %vm605_vm11, %v2263_v57, %v2264_v48  ;;  %v2309_v56 = vld [vmem:[#allocation2 + $0x18] sm:$0xff] }
 0x4d7   : > { %v604_v49 = vpop.permute.xlu1 %603  ;;  %v2252_v51 = vpop.permute.xlu0 %2251  ;;  %1630 = vrot.lane.b32.xlu1 %v1612_v31, %s2426_s10  ;;  %v568_v52 = vmax.f32 %v2612_v34, %v560_v43  ;;  %v567_v26 = vmax.f32 %v2604_v27, %v559_v29  ;;  %v569_v39 = vmax.f32 %v2614_v35, %v561_v0  ;;  %v431_v3 = vpack.c.bf16 %v2309_v56, %v2309_v56 }
 0x4d8   : > { %v2254_v17 = vunpack.i.h.bf16 %v2252_v51  ;;  %v2253_v4 = vunpack.i.l.bf16 %v2252_v51 }
 0x4d9   : > { %v593_v10 = vmax.f32 %v568_v52, %v585_v46 }
 0x4da   : > { %1632 = vrot.lane.b32.xlu0 %v1613_v13, %s2426_s10  ;;  %v583_v60 = vsel %vm582_vm10, %v2253_v4, %v2254_v17  ;;  %v584_v45 = vsel %vm582_vm10, %v2254_v17, %v2258_v61 }
 0x4db   : > { %v581_v11 = vpop.permute.xlu0 %580  ;;  %1617 = vrot.lane.b32.xlu1 %v2284_v15, %s2442_s30  ;;  %v2277_v47 = vpop.permute.xlu1 %2276  ;;  %v591_v37 = vmax.f32 %v566_v2, %v583_v60  ;;  %v592_v58 = vmax.f32 %v567_v26, %v584_v45  ;;  %v2311_v15 = vld [vmem:[#allocation2 + $0x28] sm:$0xff] }
 0x4dc   : > { %v2279_v34 = vunpack.i.h.bf16 %v2277_v47  ;;  %v2278_v21 = vunpack.i.l.bf16 %v2277_v47  ;;  %v586_v63 = vsel %vm582_vm10, %v2259_v41, %v581_v11  ;;  %v433_v13 = vpack.c.bf16 %v2311_v15, %v2311_v15  ;;  %v2312_v41 = vld [vmem:[#allocation2 + $0x20] sm:$0xff] }
 0x4dd   : > { %v594_v7 = vmax.f32 %v569_v39, %v586_v63  ;;  %v614_v33 = vmax.f32 %v591_v37, %v606_v25  ;;  %v432_v61 = vpack.c.bf16 %v2312_v41, %v2312_v41  ;;  %v3267_v11 = vmov 0   ;;  %v429_v47 = vld [vmem:[%s3254_s3] sm:$0xf] }
 0x4de   : > { %1742 = vperm.xlu0 %1999, %v1739_v22   ;;  %v631_v24 = vsel %vm628_vm12, %v2278_v21, %v2279_v34 }
 0x4df   : > { %v2267_v42 = vpop.permute.xlu0 %2266  ;;  %v650_v23 = vpop.permute.xlu1 %649  ;;  %v758_v22 = vsel %vm277_vm0, %v432_v61, 0 }
 0x4e0   : > { %v2269_v53 = vunpack.i.h.bf16 %v2267_v42  ;;  %v2268_v50 = vunpack.i.l.bf16 %v2267_v42 }
 0x4e2   : > { %v608_v38 = vsel %vm605_vm11, %v2268_v50, %v2269_v53  ;;  %v607_v54 = vsel %vm605_vm11, %v2264_v48, %v2268_v50  ;;  %v609_v27 = vsel %vm605_vm11, %v2269_v53, %v604_v49  ;;  %v430_v49 = vpack.c.bf16 %v2310_v20, %v2310_v20 }
 0x4e3   : > { %v616_v9 = vmax.f32 %v593_v10, %v608_v38  ;;  %v2272_v5 = vpop.permute.xlu0 %2271  ;;  %v615_v32 = vmax.f32 %v592_v58, %v607_v54  ;;  %v617_v44 = vmax.f32 %v594_v7, %v609_v27  ;;  %v1128_v43 = vpop.permute.xlu1 %1127 }
 0x4e4   : > { %v2274_v18 = vunpack.i.h.bf16 %v2272_v5  ;;  %v2273_v14 = vunpack.i.l.bf16 %v2272_v5  ;;  %v752_v4 = vsel %vm277_vm0, %v430_v49, 0 }
 0x4e5   : > { %v639_v8 = vmax.f32 %v616_v9, %v631_v24 }
 0x4e6   : > { %v630_v12 = vsel %vm628_vm12, %v2274_v18, %v2278_v21  ;;  %v629_v55 = vsel %vm628_vm12, %v2273_v14, %v2274_v18 }
 0x4e7   : > { %v627_v35 = vpop.permute.xlu0 %626  ;;  %v638_v1 = vmax.f32 %v615_v32, %v630_v12  ;;  %v637_v28 = vmax.f32 %v614_v33, %v629_v55  ;;  %v644_v30 = vpack.c.bf16 %v639_v8, %v639_v8  ;;  %v1132_v29 = vpop.permute.xlu1 %1131 }
 0x4e8   : > { %v632_v62 = vsel %vm628_vm12, %v2279_v34, %v627_v35 }
 0x4e9   : > { %v640_v40 = vmax.f32 %v617_v44, %v632_v62  ;;  %v643_v6 = vpack.c.bf16 %v638_v1, %v638_v1  ;;  %v642_v16 = vpack.c.bf16 %v637_v28, %v637_v28  ;;  %v661_v51 = vsel %vm277_vm0, %v644_v30, 0 }
 0x4eb   : > { %v645_v59 = vpack.c.bf16 %v640_v40, %v640_v40  ;;  %1884 = vmatprep.subr.msk.bf16.mxu1 %vm277_vm0, %v643_v6  ;;  %v1126_v31 = vpop.permute.xlu0 %1125  ;;  %v655_v36 = vsel %vm277_vm0, %v642_v16, 0  ;;  %v1119_v46 = vpop.permute.xlu1 %1118 }
 0x4ec   : > { %681 = vmatpush1.bf16.msra.mxu1 %v655_v36  ;;  %v1136_v52 = vsel %vm413_vm14, %v1126_v31, %v1128_v43 }
 0x4ed   : > { %1886 = vmatprep.subr.msk.bf16.mxu0 %vm277_vm0, %v645_v59  ;;  %1888 = vmatprep.subr.msk.bf16.mxu1 %vm277_vm0, %v431_v3  ;;  %v1144_v2 = vsel %vm277_vm0, %v1136_v52, 0 }
 0x4ee   : > { %722 = vmatpush1.bf16.msra.mxu0 %v661_v51 }
 0x4ef   : > { %1885 = vmatmul.mubr.msk.bf16.vlgmr.msra.gmra.mxu1 %vm273_vm1, %v650_v23  ;;  %1890 = vmatprep.subr.msk.bf16.mxu0 %vm277_vm0, %v433_v13  ;;  %v1130_v17 = vpop.permute.xlu0 %1129 }
 0x4f0   : > { %v1137_v19 = vsel %vm413_vm14, %v1128_v43, %v1130_v17  ;;  %778 = vmatpush1.bf16.msra.mxu1 %v752_v4  ;;  %795 = vmatprep.mubr.bf16.mxu1 %v3267_v11  ;;  %v1138_v60 = vsel %vm413_vm14, %v1130_v17, %v1132_v29 }
 0x4f1   : > { %1893 = vmatprep.subr.msk.bf16.mxu1 %vm277_vm0, %v1137_v19  ;;  %1887 = vmatmul.mubr.msk.bf16.vlgmr.msra.gmra.mxu0 %vm273_vm1, %v650_v23  ;;  %v1150_v0 = vsel %vm277_vm0, %v1138_v60, 0 }
 0x4f2   : > { %819 = vmatpush1.bf16.msra.mxu0 %v758_v22  ;;  %836 = vmatprep.mubr.bf16.mxu0 %v3267_v11 }
 0x4f7   : > { %1889 = vmatmul.mubr.msk.bf16.vlgmr.msra.gmra.mxu1 %vm273_vm1, %v429_v47 }
 0x4f8   : > { %1170 = vmatpush1.bf16.msra.mxu1 %v1144_v2  ;;  %1187 = vmatprep.mubr.bf16.mxu1 %v3267_v11 }
 0x4f9   : > { %1891 = vmatmul.mubr.msk.bf16.vlgmr.msra.gmra.mxu0 %vm273_vm1, %v429_v47 }
 0x4fa   : > { %1228 = vmatprep.mubr.bf16.mxu0 %v3267_v11 }
 0x4ff   : > { %1894 = vmatmul.mubr.msk.bf16.vlgmr.msra.gmra.mxu1 %vm273_vm1, %v1119_v46 }
 0x500   : > { %1685 = vmatprep.mubr.bf16.mxu1 %v3267_v11 }
 0x531   : > { %v1134_v48 = vpop.permute.xlu0 %1133 }
 0x532   : > { %v1139_v57 = vsel %vm413_vm14, %v1132_v29, %v1134_v48 }
 0x533   : > { %1895 = vmatprep.subr.msk.bf16.mxu0 %vm277_vm0, %v1139_v57 }
 0x534   : > { %1211 = vmatpush1.bf16.msra.mxu0 %v1150_v0 }
 0x537   : > { %1896 = vmatmul.mubr.msk.bf16.vlgmr.msra.gmra.mxu0 %vm273_vm1, %v1119_v46 }
 0x538   : > { %1726 = vmatprep.mubr.bf16.mxu0 %v3267_v11 }
 0x544   : > { %v1625_v42 = vpop.permute.xlu0 %1624 }
 0x545   : > { %v1627_v45 = vpop.permute.xlu1 %1626 }
 0x546   : > { %v1634_v34 = vsel %vm413_vm14, %v1625_v42, %v1627_v45 }
 0x547   : > { %v1642_v26 = vsel %vm277_vm0, %v1634_v34, 0 }
 0x548   : > { %v1629_v21 = vpop.permute.xlu0 %1628 }
 0x549   : > { %v1635_v53 = vsel %vm413_vm14, %v1627_v45, %v1629_v21  ;;  %v1631_v50 = vpop.permute.xlu1 %1630 }
 0x54a   : > { %1898 = vmatprep.subr.msk.bf16.mxu1 %vm277_vm0, %v1635_v53  ;;  %v1636_v10 = vsel %vm413_vm14, %v1629_v21, %v1631_v50 }
 0x54b   : > { %1668 = vmatpush1.bf16.msra.mxu1 %v1642_v26  ;;  %v1648_v54 = vsel %vm277_vm0, %v1636_v10, 0 }
 0x54c   : > { %v1633_v37 = vpop.permute.xlu0 %1632 }
 0x54d   : > { %v1637_v63 = vsel %vm413_vm14, %v1631_v50, %v1633_v37  ;;  %v1618_v38 = vpop.permute.xlu1 %1617 }
 0x54e   : > { %1899 = vmatmul.mubr.msk.bf16.vlgmr.msra.gmra.mxu1 %vm273_vm1, %v1618_v38  ;;  %1900 = vmatprep.subr.msk.bf16.mxu0 %vm277_vm0, %v1637_v63 }
 0x54f   : > { %1709 = vmatpush1.bf16.msra.mxu0 %v1648_v54 }
 0x552   : > { %1901 = vmatmul.mubr.msk.bf16.vlgmr.msra.gmra.mxu0 %vm273_vm1, %v1618_v38 }
 0x559   : > { %v1743_v51 = vpop.permute.xlu0 %1742 }
 0x5af   : > { %v700_v39 = vpop.f32.mrf.mxu1 }
 0x5b1   : > { %v741_v9 = vpop.f32.mrf.mxu0  ;;  %v702_v5 = vpop.f32.mrf.mxu1 }
 0x5b3   : > { %v743_v58 = vpop.f32.mrf.mxu0  ;;  %v704_v25 = vpop.f32.mrf.mxu1 }
 0x5b5   : > { %v745_v18 = vpop.f32.mrf.mxu0  ;;  %v705_v14 = vpop.f32.mrf.mxu1 }
 0x5b7   : > { %v746_v27 = vpop.f32.mrf.mxu0  ;;  %v797_v24 = vpop.f32.mrf.mxu1 }
 0x5b8   : > { %v798_v7 = vadd.f32 %v797_v24, %v700_v39 }
 0x5b9   : > { %v838_v32 = vpop.f32.mrf.mxu0  ;;  %v799_v33 = vpop.f32.mrf.mxu1 }
 0x5ba   : > { %v839_v8 = vadd.f32 %v838_v32, %v741_v9  ;;  %v800_v12 = vadd.f32 %v799_v33, %v702_v5 }
 0x5bb   : > { %v840_v55 = vpop.f32.mrf.mxu0  ;;  %v801_v35 = vpop.f32.mrf.mxu1 }
 0x5bc   : > { %v841_v44 = vadd.f32 %v840_v55, %v743_v58 }
 0x5bd   : > { %v842_v1 = vpop.f32.mrf.mxu0  ;;  %v802_v28 = vpop.f32.mrf.mxu1 }
 0x5bf   : > { %v843_v62 = vpop.f32.mrf.mxu0  ;;  %v1189_v23 = vpop.f32.mrf.mxu1 }
 0x5c0   : > { %v1237_v40 = vadd.f32 %v1189_v23, %v798_v7 }
 0x5c1   : > { %v1191_v6 = vpop.f32.mrf.mxu1 }
 0x5c2   : > { %v1238_v16 = vadd.f32 %v1191_v6, %v800_v12 }
 0x5c3   : > { %v1193_v30 = vpop.f32.mrf.mxu1 }
 0x5c5   : > { %v1194_v59 = vpop.f32.mrf.mxu1 }
 0x5f7   : > { %v1230_v31 = vpop.f32.mrf.mxu0 }
 0x5f8   : > { %v1239_v13 = vadd.f32 %v1230_v31, %v839_v8 }
 0x5f9   : > { %v1232_v36 = vpop.f32.mrf.mxu0 }
 0x5fa   : > { %v1240_v4 = vadd.f32 %v1232_v36, %v841_v44 }
 0x5fb   : > { %v1234_v56 = vpop.f32.mrf.mxu0 }
 0x5fd   : > { %v1235_v3 = vpop.f32.mrf.mxu0 }
 0x60e   : > { %v1687_v20 = vpop.f32.mrf.mxu1 }
 0x60f   : > { %v1735_v49 = vadd.f32 %v1687_v20, %v1237_v40 }
 0x610   : > { %v1689_v15 = vpop.f32.mrf.mxu1 }
 0x611   : > { %v1745_v41 = vadd.f32 %v1743_v51, %v1735_v49  ;;  %v1736_v61 = vadd.f32 %v1689_v15, %v1238_v16 }
 0x612   : > { %v1728_v43 = vpop.f32.mrf.mxu0  ;;  %v1691_v17 = vpop.f32.mrf.mxu1 }
 0x613   : > { %v1902_v19 = vmul.f32 -1.442695, %v1745_v41  ;;  %v1746_v11 = vadd.f32 %v1743_v51, %v1736_v61  ;;  %v1737_v22 = vadd.f32 %v1728_v43, %v1239_v13 }
 0x614   : > { %v1730_v52 = vpop.f32.mrf.mxu0  ;;  %v1692_v47 = vpop.f32.mrf.mxu1 }
 0x615   : > { %2293 = vpow2.f32 %v1902_v19  ;;  %v1903_v2 = vmul.f32 -1.442695, %v1746_v11  ;;  %v1747_v29 = vadd.f32 %v1743_v51, %v1737_v22  ;;  %v1738_v46 = vadd.f32 %v1730_v52, %v1240_v4 }
 0x616   : > { %v1732_v60 = vpop.f32.mrf.mxu0 }
 0x617   : > { %2295 = vpow2.f32 %v1903_v2  ;;  %v1904_v48 = vmul.f32 -1.442695, %v1747_v29  ;;  %v1748_v57 = vadd.f32 %v1743_v51, %v1738_v46 }
 0x618   : > { %v1733_v0 = vpop.f32.mrf.mxu0 }
 0x619   : > { %2297 = vpow2.f32 %v1904_v48  ;;  %v1905_v42 = vmul.f32 -1.442695, %v1748_v57 }
 0x61b   : > { %2299 = vpow2.f32 %v1905_v42 }
 0x622   : > { %v2294_v45 = vpop.eup %2293 }
 0x623   : > { %v1761_v34 = vadd.f32 1.0, %v2294_v45 }
 0x624   : > { %v2296_v21 = vpop.eup %2295 }
 0x625   : > { %2301 = vrcp.f32 %v1761_v34  ;;  %v1762_v53 = vadd.f32 1.0, %v2296_v21 }
 0x626   : > { %v2298_v50 = vpop.eup %2297 }
 0x627   : > { %2303 = vrcp.f32 %v1762_v53  ;;  %v1763_v26 = vadd.f32 1.0, %v2298_v50 }
 0x628   : > { %v2300_v10 = vpop.eup %2299 }
 0x629   : > { %2305 = vrcp.f32 %v1763_v26  ;;  %v1764_v37 = vadd.f32 1.0, %v2300_v10 }
 0x62b   : > { %2307 = vrcp.f32 %v1764_v37 }
 0x632   : > { %v2302_v63 = vpop.eup %2301 }
 0x633   : > { %v1773_v38 = vmul.f32 %v2302_v63, %v1745_v41 }
 0x634   : > { %v2304_v54 = vpop.eup %2303 }
 0x635   : > { %1777 = vst [vmem:[%s2548_s23] sm:$0xff] %v1773_v38  ;;  %v1774_v39 = vmul.f32 %v2304_v54, %v1746_v11 }
 0x636   : > { %v2306_v9 = vpop.eup %2305 }
 0x637   : > { %1778 = vst [vmem:[%s2548_s23 + $0x8] sm:$0xff] %v1774_v39  ;;  %v1775_v5 = vmul.f32 %v2306_v9, %v1747_v29 }
 0x638   : > { %v2308_v58 = vpop.eup %2307 }
 0x639   : > { %1779 = vst [vmem:[%s2548_s23 + $0x10] sm:$0xff] %v1775_v5  ;;  %v1776_v25 = vmul.f32 %v2308_v58, %v1748_v57 }
 0x63b   : > { %1780 = vst [vmem:[%s2548_s23 + $0x18] sm:$0xff] %v1776_v25 }
 0x63c   : > { %2352 = shalt.err (!%p2349_p1)
}
 0x63d   : > { %s2353_s30 = scalar_lea.hbm %s1794_s25, 512  ;;  %s2357_s12 = scalar_lea.hbm %s3256_s5, 1024 }
 0x63e   : > { %p2354_p2 = scmp.ne.s32.totalorder %s1794_s25, %s2353_s30  ;;  %p2358_p7 = scmp.lt.s32.totalorder %s1794_s25, %s3256_s5 }
 0x63f   : > { %p2359_p6 = scmp.lt.s32.totalorder %s2357_s12, %s2353_s30 }
 0x640   : > { %p2355_p3 = pnand %p2354_p2, %p2512_p5 }
 0x641   : > { %p2360_p8 = por %p2359_p6, %p2358_p7 }
 0x642   : > { %p2356_p4 = pneg %p2355_p3 }
 0x644   : > { %p2361_p9 = pnand %p2360_p8, %p2356_p4 }
 0x646   : > { %2364 = shalt.err (!%p2361_p9)
}
 0x647   : > { %1916 = dma.vmem_to_hbm [thread:$0]  (%p2512_p5), %s1797_s13, 512, %s1794_s25, %s1782_s26  }
 0x648 PF: > { %p1928_p10 = scmp.ge.s32.totalorder %s2403_s21, 2  ;;  %s1808_s16 = sand.u32 1, %s2391_s18  }
 0x649   : > { %p3268_p11 = scmp.ne.s32.totalorder %s3262_s29, 0  ;;  %s1809_s9 = scalar_lea.sflag [#allocation6], %s1808_s16 }
 0x64b   : > { %p1923_p12 = pnand %p1928_p10, %p3268_p11 }
 0x64d   : > { %p1924_p13 = pneg %p1923_p12 }
 0x64f   : > { %2386 = dma.done.wait (%p1924_p13), %s1809_s9, 512  }
 0x650   : > { %2388 = vsyncadd (%p1924_p13), %s1809_s9, 4294966784  ;;  %p16_p0 = scmp.ge.s32.totalorder %s2499_s24, 4   ;;  %s3269_s18 = smov %s2395_s19 }
 0x651   : > { %s3270_s19 = smov %s2399_s20  ;;  %s3271_s20 = smov %s2510_s27 }
 0x652   : > { %s3272_s21 = smov %s2499_s24  ;;  %18 = sbr.rel (!%p16_p0) target bundleno = 4 (0x4), region = 84 }
 0x657   :  { %1814 = vsyncpa [#allocation5], 1 }
 0x658   :  { %1816 = vsyncpa [#allocation5 + $0x1], 1 }
 0x659   :  { %1817 = vsyncpa [#allocation6], 1 }
 0x65a   :  { %1819 = vsyncpa [#allocation6 + $0x1], 1 }

</bundles_post_ra>
